<compile_context>
chip_gen: v6e
topology: v6e:2x2x1
jax: 0.10.0
libtpu: 0.0.40
codegen_flags: <defaults>
</compile_context>

<pallas_src>
import numpy as np
import jax
import jax.numpy as jnp
from jax.experimental import pallas as pl
from jax.experimental.pallas import tpu as pltpu


# ----------------------------------------------------------------------------
# Small helpers
# ----------------------------------------------------------------------------
def _round_up(x, m):
    return ((x + m - 1) // m) * m


def _pad_last(x, target):
    pad = target - x.shape[-1]
    if pad == 0:
        return x
    widths = [(0, 0)] * (x.ndim - 1) + [(0, pad)]
    return jnp.pad(x, widths)


def _tpu_topology():
    """Returns (per-TensorCore VMEM bytes, #TensorCores sharing the grid).
    Conservative defaults if the query is unavailable."""
    vmem = None
    try:
        vmem = int(pltpu.get_tpu_info().vmem_capacity_bytes)
    except Exception:
        pass
    kind = ""
    try:
        kind = jax.devices()[0].device_kind.lower()
    except Exception:
        pass
    # v7x has 2 TensorCores per chip (and 64 MiB VMEM per TC); v5e/v6e have 1.
    cores = 2 if ("v7" in kind or (vmem is not None and vmem <= 64 * 1024 * 1024)) else 1
    if vmem is None:
        vmem = 64 * 1024 * 1024        # conservative; still ample for our tiles
    return vmem, cores


def _choose_row_block(bn, max_rows, n_cores=1, align=16):
    """Largest `align`-multiple divisor of bn that fits the VMEM-derived row
    budget; full-extent block when that is legal and best.  On multi-TC chips
    prefer block counts that keep every TensorCore busy."""
    max_rows = max(align, max_rows)
    divs = [d for d in range(align, bn + 1, align) if bn % d == 0]
    if n_cores > 1:
        pref = [d for d in divs if d <= max_rows and (bn // d) % n_cores == 0]
        if not pref:
            pref = [d for d in divs if d <= max_rows and (bn // d) >= n_cores]
        if pref:
            return max(pref)
    fit = [d for d in divs if d <= max_rows]
    if bn <= max_rows and (n_cores == 1 or not fit):
        return bn                                  # full-extent block: always legal
    if fit:
        return max(fit)
    return min(divs) if divs else bn


# ----------------------------------------------------------------------------
# Pallas kernel: the serial GRU recurrence (the only part that cannot be
# batched over time).  One grid step handles one independent block of rows
# (graph nodes); the time loop lives inside the kernel.
# ----------------------------------------------------------------------------
def gru_recurrence_kernel(gi_ref, whh_ref, bhn_ref, h_seq_ref, h_sc):
    """
    gi_ref   : (T, rows, 3*Hp) bf16  precomputed input gates [r|z|n] with b_ih
                                     (and the r/z parts of b_hh) folded in
    whh_ref  : (Hp, 3*Hp)      bf16  fused hidden-to-hidden weights [r|z|n]
    bhn_ref  : (1, Hp)         f32   hidden bias of the n gate (used inside r*(.))
    h_seq_ref: (T, rows, Hp)   bf16  hidden state after each step (lane-dense)
    h_sc     : (rows, Hp)      f32   VMEM scratch holding the hidden carry
    """
    T, rows, Hp3 = gi_ref.shape
    Hp = Hp3 // 3

    h_sc[...] = jnp.zeros_like(h_sc)
    # Hoisted out of the time loop: JAX does not CSE broadcast_in_dim.
    bhn = jnp.broadcast_to(bhn_ref[...], (rows, Hp))

    def step(t, carry):
        h = h_sc[...]
        # One fused MXU matmul per step: (rows, Hp) x (Hp, 3*Hp), f32 accumulate.
        gh = jnp.dot(h.astype(whh_ref.dtype), whh_ref[...],
                     preferred_element_type=jnp.float32)
        gi = gi_ref[t].astype(jnp.float32)
        # Lane-aligned (multiple-of-128) slices of the fused gate blocks: free.
        r = jax.nn.sigmoid(gi[:, 0:Hp] + gh[:, 0:Hp])
        z = jax.nn.sigmoid(gi[:, Hp:2 * Hp] + gh[:, Hp:2 * Hp])
        n = jnp.tanh(gi[:, 2 * Hp:] + r * (gh[:, 2 * Hp:] + bhn))
        h_new = (1.0 - z) * n + z * h
        h_sc[...] = h_new
        h_seq_ref[t] = h_new.astype(h_seq_ref.dtype)
        return carry

    # Partial unroll lets the LLO scheduler overlap step t+1's gi loads and
    # step t-1's h_seq stores with the current matmul chain.
    jax.lax.fori_loop(0, T, step, 0, unroll=(T if T <= 8 else 4))


def run_gru_recurrence(gi_cat, whh_cat, bhn):
    T, BN, Hp3 = gi_cat.shape
    Hp = Hp3 // 3

    vmem_phys, n_cores = _tpu_topology()
    vmem_limit = int(min(vmem_phys * 3 // 4, 100 * 2 ** 20))
    # Per-row VMEM: double-buffered bf16 gi (3*Hp) + bf16 h_seq (Hp) + f32 carry.
    bytes_per_row = 2 * T * (3 * Hp + Hp) * 2 + Hp * 4
    fixed = 2 * int(whh_cat.size) * 2 + 64 * 1024      # double-buffered weights + slack
    budget = max(vmem_limit * 4 // 5 - fixed, bytes_per_row * 16)
    rows = _choose_row_block(BN, budget // bytes_per_row, n_cores)
    grid = (BN // rows,) if BN % rows == 0 else (pl.cdiv(BN, rows),)

    gi_spec = pl.BlockSpec((T, rows, 3 * Hp), lambda i: (0, i, 0))
    # Weights are tiny at Hp=128; single-buffer them when Hp grows to save VMEM.
    w_kwargs = {"pipeline_mode": pl.Buffered(1)} if Hp >= 256 else {}
    w_spec = pl.BlockSpec((Hp, 3 * Hp), lambda i: (0, 0), **w_kwargs)
    b_spec = pl.BlockSpec((1, Hp), lambda i: (0, 0))
    out_spec = pl.BlockSpec((T, rows, Hp), lambda i: (0, i, 0))

    return pl.pallas_call(
        gru_recurrence_kernel,
        out_shape=jax.ShapeDtypeStruct((T, BN, Hp), jnp.bfloat16),
        grid=grid,
        in_specs=[gi_spec, w_spec, b_spec],
        out_specs=out_spec,
        scratch_shapes=[pltpu.VMEM((rows, Hp), jnp.float32)],
        compiler_params=pltpu.CompilerParams(
            dimension_semantics=("parallel",),        # row blocks are independent
            vmem_limit_bytes=vmem_limit),
    )(gi_cat, whh_cat, bhn)


# ----------------------------------------------------------------------------
# Plain-JAX glue: feature preprocessing, GCN message passing, batched matmuls
# ----------------------------------------------------------------------------
def rfft_abs_last(x):
    """|rfft(x, axis=-1)| computed via an explicit DFT matmul (small T)."""
    T = x.shape[-1]
    K = T // 2 + 1
    n = jnp.arange(T, dtype=jnp.float32)[:, None]
    k = jnp.arange(K, dtype=jnp.float32)[None, :]
    ang = -2.0 * jnp.pi * n * k / T
    re = x @ jnp.cos(ang)
    im = x @ jnp.sin(ang)
    return jnp.sqrt(re * re + im * im)


def l2_normalize(x, axis, eps=1e-12):
    denom = jnp.maximum(jnp.sqrt(jnp.sum(x * x, axis=axis, keepdims=True)), eps)
    return x / denom


def gcn_conv_batched(x_seq, edge_index, w, b, num_nodes):
    """PyG GCNConv (add_self_loops=True, symmetric norm, deg==0 -> 0), batched
    over all timesteps in edge-list form -- avoids materializing the dense
    (B*N)^2 adjacency and its matmul (which would dominate realistic sizes)."""
    f32, bf16 = jnp.float32, jnp.bfloat16
    loops = jnp.arange(num_nodes, dtype=edge_index.dtype)
    src = jnp.concatenate([edge_index[0], loops])
    dst = jnp.concatenate([edge_index[1], loops])
    deg = jnp.zeros((num_nodes,), f32).at[dst].add(1.0)
    d_inv_sqrt = jnp.where(deg > 0.0, jax.lax.rsqrt(jnp.maximum(deg, 1e-12)), 0.0)
    norm = d_inv_sqrt[src] * d_inv_sqrt[dst]                        # (E,)
    xw = jnp.einsum("tnd,dh->tnh", x_seq.astype(bf16), w.astype(bf16),
                    preferred_element_type=f32)                     # (T, BN, H)
    msg = xw[:, src, :] * norm[None, :, None]                       # (T, E, H)
    g = jnp.zeros_like(xw).at[:, dst, :].add(msg)                   # scatter over dst
    return jnp.maximum(g + b[None, None, :], 0.0)


def tgcn_emb_forward(x, edge_index, params, pre_len, a=1.0):
    B, T, N, _ = x.shape
    BN = B * N
    f32, bf16 = jnp.float32, jnp.bfloat16

    # ---- feature preprocessing (XLA) --------------------------------------
    tid_idx = jnp.round(x[..., 1] * 287).astype(jnp.int32)
    diw_idx = jnp.round(x[..., 2] * 6).astype(jnp.int32)
    T_D = params["T_i_D_emb"][tid_idx]                      # (B,T,N,3)
    D_W = params["D_i_W_emb"][diw_idx]                      # (B,T,N,3)

    speed = x[..., 0:1]                                     # (B,T,N,1)
    sp = jnp.transpose(speed, (0, 3, 2, 1))                 # (B,1,N,T)
    xn1 = rfft_abs_last(sp)                                 # (B,1,N,fft_len)
    xn1 = l2_normalize(xn1, axis=1)
    xn1 = l2_normalize(xn1, axis=2) * a
    xn1 = jnp.matmul(xn1, params["Ex1"])                    # (B,1,N,emb_speed)
    xn1 = jnp.transpose(xn1, (0, 3, 2, 1))                  # (B,emb_speed==T,N,1)

    embeddings = jnp.concatenate([T_D, D_W], axis=-1)       # (B,T,N,6)
    x_combined = jnp.concatenate(
        [speed, xn1, embeddings, x[..., 3:]], axis=-1)      # (B,T,N,Din)
    Din = x_combined.shape[-1]
    x_seq = jnp.transpose(x_combined, (1, 0, 2, 3)).reshape(T, BN, Din)

    # ---- non-recurrent matmuls, batched over all timesteps (XLA) ----------
    H = params["gcn_w"].shape[1]
    Hp = _round_up(H, 128)
    C = params["fc_w"].shape[1]

    # GCNConv + ReLU for every timestep (no recurrence involved).
    g = gcn_conv_batched(x_seq, edge_index, params["gcn_w"], params["gcn_b"], BN)

    # GRU input gates for all timesteps (PyTorch gate order r, z, n); b_ih and
    # the r/z parts of b_hh folded in.  Gates travel as a single fused
    # (T, BN, 3*Hp) bf16 slab of lane-aligned 128-wide per-gate blocks.
    gi = jnp.einsum("tmh,hk->tmk", g.astype(bf16),
                    params["gru_wih"].astype(bf16), preferred_element_type=f32)
    bih, bhh = params["gru_bih"], params["gru_bhh"]
    gi_r = _pad_last(gi[..., 0 * H:1 * H] + bih[0 * H:1 * H] + bhh[0 * H:1 * H], Hp)
    gi_z = _pad_last(gi[..., 1 * H:2 * H] + bih[1 * H:2 * H] + bhh[1 * H:2 * H], Hp)
    gi_n = _pad_last(gi[..., 2 * H:3 * H] + bih[2 * H:3 * H], Hp)
    gi_cat = jnp.concatenate([gi_r, gi_z, gi_n], axis=-1).astype(bf16)

    # Hidden-to-hidden weights fused into one (Hp, 3*Hp) bf16 operand; the
    # zero-padding is exact for a GRU (padded units stay identically 0).
    whh = params["gru_whh"]

    def gate_w(k):
        w = whh[:, k * H:(k + 1) * H]
        return jnp.pad(w, ((0, Hp - H), (0, Hp - H)))

    whh_cat = jnp.concatenate([gate_w(0), gate_w(1), gate_w(2)], axis=-1).astype(bf16)
    bhn = _pad_last(bhh[None, 2 * H:3 * H], Hp)              # (1, Hp) f32

    # ---- Pallas kernel: the genuinely serial GRU recurrence ---------------
    h_seq = run_gru_recurrence(gi_cat, whh_cat, bhn)          # (T, BN, Hp) bf16

    # ---- FC head, one batched matmul over all timesteps (XLA) -------------
    # TODO(synk): for Hp > 128, fuse this projection into the kernel epilogue
    # (emit (T, BN, Cp) directly) to skip the h_seq HBM round trip.
    out_seq = jnp.einsum("tmh,hc->tmc", h_seq[..., :H],
                         params["fc_w"].astype(bf16),
                         preferred_element_type=f32) + params["fc_b"]

    # Replicate torch exactly: stack(dim=1) -> (BN, T, C); .reshape(B, T, N, C).
    # NOTE: raw row-major reinterpretation of (N, T) -> (T, N) inside each batch
    # block (a dim-mix); faithfully matches the reference module even when T != N.
    outputs = jnp.transpose(out_seq, (1, 0, 2)).reshape(B, T, N, C)
    return outputs[:, -pre_len:, :, :]


# ----------------------------------------------------------------------------
# Deterministic parameter construction (mirrors the module's __init__ shapes)
# ----------------------------------------------------------------------------
def init_params(key, in_channels, hidden, out_channels, seq_len,
                num_emb_1=288, num_emb_2=7, emb_dim=3, emb_speed=None):
    emb_speed = seq_len if emb_speed is None else emb_speed
    fft_len = seq_len // 2 + 1
    gcn_in = in_channels - 2 + emb_dim + emb_dim + 1
    ks = jax.random.split(key, 10)

    def xavier(k, shape):
        bound = np.sqrt(6.0 / (shape[0] + shape[1]))
        return jax.random.uniform(k, shape, jnp.float32, -bound, bound)

    ku = 1.0 / np.sqrt(hidden)
    return {
        "T_i_D_emb": xavier(ks[0], (num_emb_1, emb_dim)),
        "D_i_W_emb": xavier(ks[1], (num_emb_2, emb_dim)),
        "Ex1": jax.random.normal(ks[2], (fft_len, emb_speed), jnp.float32),
        "gcn_w": xavier(ks[3], (gcn_in, hidden)),
        "gcn_b": jnp.zeros((hidden,), jnp.float32),
        "gru_wih": jax.random.uniform(ks[4], (hidden, 3 * hidden), jnp.float32, -ku, ku),
        "gru_whh": jax.random.uniform(ks[5], (hidden, 3 * hidden), jnp.float32, -ku, ku),
        "gru_bih": jax.random.uniform(ks[6], (3 * hidden,), jnp.float32, -ku, ku),
        "gru_bhh": jax.random.uniform(ks[7], (3 * hidden,), jnp.float32, -ku, ku),
        "fc_w": jax.random.uniform(ks[8], (hidden, out_channels), jnp.float32, -ku, ku),
        "fc_b": jax.random.uniform(ks[9], (out_channels,), jnp.float32, -ku, ku),
    }


if __name__ == "__main__":
    # Small shapes consistent with the module's forward.
    B, T, N = 2, 8, 16
    in_channels = 4            # [speed, time_in_day, day_in_week, 1 extra feature]
    hidden, out_channels = 32, 2
    pre_len = 3
    # Note: the torch concat requires emb_speed == seq_len; we honor that.

    key = jax.random.PRNGKey(0)
    kx, kp = jax.random.split(key)
    x = jax.random.uniform(kx, (B, T, N, in_channels), jnp.float32)  # feats in [0,1)

    # Ring graph inside each batch block (edge_index over B*N nodes, both directions).
    src, dst = [], []
    for b in range(B):
        for i in range(N):
            u, v = b * N + i, b * N + (i + 1) % N
            src += [u, v]
            dst += [v, u]
    edge_index = jnp.asarray(np.stack([src, dst]), dtype=jnp.int32)

    params = init_params(kp, in_channels, hidden, out_channels, T)

    fwd = jax.jit(tgcn_emb_forward, static_argnames=("pre_len",))
    out = fwd(x, edge_index, params, pre_len=pre_len)
    out = jax.block_until_ready(out)
    assert out.shape == (B, pre_len, N, out_channels), out.shape
    assert bool(jnp.all(jnp.isfinite(out)))
    print("KERNEL_OK")
</pallas_src>

<mosaic_0001>
module attributes {stable_mosaic.version = 11 : i64} {
  func.func private @main(%arg0: i32) attributes {dimension_semantics = [#tpu.dimension_semantics<core_parallel>], iteration_bounds = array<i64: 2>, tpu.core_type = #tpu.core_type<sc_scalar_subcore>, window_params = []} {
    return
  }
}

module attributes {stable_mosaic.version = 11 : i64} {
  func.func private @main(%arg0: i32) attributes {dimension_semantics = [#tpu.dimension_semantics<core_parallel>], iteration_bounds = array<i64: 2>, tpu.core_type = #tpu.core_type<sc_scalar_subcore>, window_params = []} {
    return
  }
}

module attributes {stable_mosaic.version = 11 : i64} {
  func.func @gru_recurrence_kernel(%arg0: i32, %arg1: memref<8x32x384xbf16, #tpu.memory_space<vmem>>, %arg2: memref<128x384xbf16, #tpu.memory_space<vmem>>, %arg3: memref<1x128xf32, #tpu.memory_space<vmem>>, %arg4: memref<8x32x128xbf16, #tpu.memory_space<vmem>>, %arg5: memref<32x128xf32, #tpu.memory_space<vmem>>) attributes {dimension_semantics = [#tpu.dimension_semantics<parallel>], iteration_bounds = array<i64: 1>, scalar_prefetch = 0 : i64, scratch_operands = 1 : i64, tpu.core_type = #tpu.core_type<tc>, window_params = [{transform_indices = @transform_0, window_bounds = array<i64: 8, 32, 384>}, {pipeline_mode = #tpu.pipeline_mode<synchronous>, transform_indices = @transform_1, window_bounds = array<i64: 128, 384>}, {pipeline_mode = #tpu.pipeline_mode<synchronous>, transform_indices = @transform_2, window_bounds = array<i64: 1, 128>}, {transform_indices = @transform_3, window_bounds = array<i64: 8, 32, 128>}]} {
    %cst = arith.constant 0.000000e+00 : f32
    %0 = vector.broadcast %cst : f32 to vector<32x128xf32>
    %c0 = arith.constant 0 : index
    %c0_0 = arith.constant 0 : index
    %1 = vector.load %arg5[%c0, %c0_0] : memref<32x128xf32, #tpu.memory_space<vmem>>, vector<32x128xf32>
    tpu.vector_store %arg5[%c0, %c0_0], %0 {strides = array<i32>} : memref<32x128xf32, #tpu.memory_space<vmem>>, vector<32x128xf32>,
    %c0_1 = arith.constant 0 : index
    %c0_2 = arith.constant 0 : index
    %2 = vector.load %arg3[%c0_1, %c0_2] : memref<1x128xf32, #tpu.memory_space<vmem>>, vector<1x128xf32>
    %3 = vector.shape_cast %2 : vector<1x128xf32> to vector<1x128xf32>
    %4 = vector.broadcast %3 : vector<1x128xf32> to vector<32x128xf32>
    %c0_i32 = arith.constant 0 : i32
    %c0_3 = arith.constant 0 : index
    %c0_4 = arith.constant 0 : index
    %5 = vector.load %arg5[%c0_3, %c0_4] : memref<32x128xf32, #tpu.memory_space<vmem>>, vector<32x128xf32>
    %6 = arith.truncf %5 : vector<32x128xf32> to vector<32x128xbf16>
    %c0_5 = arith.constant 0 : index
    %c0_6 = arith.constant 0 : index
    %7 = vector.load %arg2[%c0_5, %c0_6] : memref<128x384xbf16, #tpu.memory_space<vmem>>, vector<128x384xbf16>
    %cst_7 = arith.constant dense<0.000000e+00> : vector<32x384xf32>
    %8 = tpu.matmul %6, %7, %cst_7 {dimension_numbers = #tpu.dot_dimension_numbers<[1], [0], [0], [1], [0, 0, 1, 1], [], []>} : vector<32x128xbf16>, vector<128x384xbf16>, vector<32x384xf32> -> vector<32x384xf32>
    %9 = arith.index_cast %c0_i32 : i32 to index
    %c0_8 = arith.constant 0 : index
    %c0_9 = arith.constant 0 : index
    %10 = vector.load %arg1[%9, %c0_8, %c0_9] : memref<8x32x384xbf16, #tpu.memory_space<vmem>>, vector<1x32x384xbf16>
    %11 = vector.shape_cast %10 : vector<1x32x384xbf16> to vector<32x384xbf16>
    %12 = arith.extf %11 : vector<32x384xbf16> to vector<32x384xf32>
    %13 = vector.extract_strided_slice %12 {offsets = [0, 0], sizes = [32, 128], strides = [1, 1]} : vector<32x384xf32> to vector<32x128xf32>
    %14 = vector.extract_strided_slice %8 {offsets = [0, 0], sizes = [32, 128], strides = [1, 1]} : vector<32x384xf32> to vector<32x128xf32>
    %15 = arith.addf %13, %14 : vector<32x128xf32>
    %16 = arith.negf %15 : vector<32x128xf32>
    %17 = math.exp %16 : vector<32x128xf32>
    %cst_10 = arith.constant 1.000000e+00 : f32
    %18 = vector.broadcast %cst_10 : f32 to vector<32x128xf32>
    %19 = arith.addf %18, %17 : vector<32x128xf32>
    %20 = arith.divf %18, %19 : vector<32x128xf32>
    %21 = vector.extract_strided_slice %12 {offsets = [0, 128], sizes = [32, 128], strides = [1, 1]} : vector<32x384xf32> to vector<32x128xf32>
    %22 = vector.extract_strided_slice %8 {offsets = [0, 128], sizes = [32, 128], strides = [1, 1]} : vector<32x384xf32> to vector<32x128xf32>
    %23 = arith.addf %21, %22 : vector<32x128xf32>
    %24 = arith.negf %23 : vector<32x128xf32>
    %25 = math.exp %24 : vector<32x128xf32>
    %cst_11 = arith.constant 1.000000e+00 : f32
    %26 = vector.broadcast %cst_11 : f32 to vector<32x128xf32>
    %27 = arith.addf %26, %25 : vector<32x128xf32>
    %28 = arith.divf %26, %27 : vector<32x128xf32>
    %29 = vector.extract_strided_slice %12 {offsets = [0, 256], sizes = [32, 128], strides = [1, 1]} : vector<32x384xf32> to vector<32x128xf32>
    %30 = vector.extract_strided_slice %8 {offsets = [0, 256], sizes = [32, 128], strides = [1, 1]} : vector<32x384xf32> to vector<32x128xf32>
    %31 = arith.addf %30, %4 : vector<32x128xf32>
    %32 = arith.mulf %20, %31 : vector<32x128xf32>
    %33 = arith.addf %29, %32 : vector<32x128xf32>
    %34 = math.tanh %33 : vector<32x128xf32>
    %cst_12 = arith.constant 1.000000e+00 : f32
    %35 = vector.broadcast %cst_12 : f32 to vector<32x128xf32>
    %36 = arith.subf %35, %28 : vector<32x128xf32>
    %37 = arith.mulf %36, %34 : vector<32x128xf32>
    %38 = arith.mulf %28, %5 : vector<32x128xf32>
    %39 = arith.addf %37, %38 : vector<32x128xf32>
    %c0_13 = arith.constant 0 : index
    %c0_14 = arith.constant 0 : index
    %40 = vector.load %arg5[%c0_13, %c0_14] : memref<32x128xf32, #tpu.memory_space<vmem>>, vector<32x128xf32>
    tpu.vector_store %arg5[%c0_13, %c0_14], %39 {strides = array<i32>} : memref<32x128xf32, #tpu.memory_space<vmem>>, vector<32x128xf32>,
    %41 = arith.truncf %39 : vector<32x128xf32> to vector<32x128xbf16>
    %42 = arith.index_cast %c0_i32 : i32 to index
    %c0_15 = arith.constant 0 : index
    %c0_16 = arith.constant 0 : index
    %43 = vector.load %arg4[%42, %c0_15, %c0_16] : memref<8x32x128xbf16, #tpu.memory_space<vmem>>, vector<1x32x128xbf16>
    %44 = vector.shape_cast %43 : vector<1x32x128xbf16> to vector<32x128xbf16>
    %45 = vector.shape_cast %41 : vector<32x128xbf16> to vector<1x32x128xbf16>
    tpu.vector_store %arg4[%42, %c0_15, %c0_16], %45 {strides = array<i32>} : memref<8x32x128xbf16, #tpu.memory_space<vmem>>, vector<1x32x128xbf16>,
    %c1_i32 = arith.constant 1 : i32
    %c0_17 = arith.constant 0 : index
    %c0_18 = arith.constant 0 : index
    %46 = vector.load %arg5[%c0_17, %c0_18] : memref<32x128xf32, #tpu.memory_space<vmem>>, vector<32x128xf32>
    %47 = arith.truncf %46 : vector<32x128xf32> to vector<32x128xbf16>
    %c0_19 = arith.constant 0 : index
    %c0_20 = arith.constant 0 : index
    %48 = vector.load %arg2[%c0_19, %c0_20] : memref<128x384xbf16, #tpu.memory_space<vmem>>, vector<128x384xbf16>
    %cst_21 = arith.constant dense<0.000000e+00> : vector<32x384xf32>
    %49 = tpu.matmul %47, %48, %cst_21 {dimension_numbers = #tpu.dot_dimension_numbers<[1], [0], [0], [1], [0, 0, 1, 1], [], []>} : vector<32x128xbf16>, vector<128x384xbf16>, vector<32x384xf32> -> vector<32x384xf32>
    %50 = arith.index_cast %c1_i32 : i32 to index
    %c0_22 = arith.constant 0 : index
    %c0_23 = arith.constant 0 : index
    %51 = vector.load %arg1[%50, %c0_22, %c0_23] : memref<8x32x384xbf16, #tpu.memory_space<vmem>>, vector<1x32x384xbf16>
    %52 = vector.shape_cast %51 : vector<1x32x384xbf16> to vector<32x384xbf16>
    %53 = arith.extf %52 : vector<32x384xbf16> to vector<32x384xf32>
    %54 = vector.extract_strided_slice %53 {offsets = [0, 0], sizes = [32, 128], strides = [1, 1]} : vector<32x384xf32> to vector<32x128xf32>
    %55 = vector.extract_strided_slice %49 {offsets = [0, 0], sizes = [32, 128], strides = [1, 1]} : vector<32x384xf32> to vector<32x128xf32>
    %56 = arith.addf %54, %55 : vector<32x128xf32>
    %57 = arith.negf %56 : vector<32x128xf32>
    %58 = math.exp %57 : vector<32x128xf32>
    %cst_24 = arith.constant 1.000000e+00 : f32
    %59 = vector.broadcast %cst_24 : f32 to vector<32x128xf32>
    %60 = arith.addf %59, %58 : vector<32x128xf32>
    %61 = arith.divf %59, %60 : vector<32x128xf32>
    %62 = vector.extract_strided_slice %53 {offsets = [0, 128], sizes = [32, 128], strides = [1, 1]} : vector<32x384xf32> to vector<32x128xf32>
    %63 = vector.extract_strided_slice %49 {offsets = [0, 128], sizes = [32, 128], strides = [1, 1]} : vector<32x384xf32> to vector<32x128xf32>
    %64 = arith.addf %62, %63 : vector<32x128xf32>
    %65 = arith.negf %64 : vector<32x128xf32>
    %66 = math.exp %65 : vector<32x128xf32>
    %cst_25 = arith.constant 1.000000e+00 : f32
    %67 = vector.broadcast %cst_25 : f32 to vector<32x128xf32>
    %68 = arith.addf %67, %66 : vector<32x128xf32>
    %69 = arith.divf %67, %68 : vector<32x128xf32>
    %70 = vector.extract_strided_slice %53 {offsets = [0, 256], sizes = [32, 128], strides = [1, 1]} : vector<32x384xf32> to vector<32x128xf32>
    %71 = vector.extract_strided_slice %49 {offsets = [0, 256], sizes = [32, 128], strides = [1, 1]} : vector<32x384xf32> to vector<32x128xf32>
    %72 = arith.addf %71, %4 : vector<32x128xf32>
    %73 = arith.mulf %61, %72 : vector<32x128xf32>
    %74 = arith.addf %70, %73 : vector<32x128xf32>
    %75 = math.tanh %74 : vector<32x128xf32>
    %cst_26 = arith.constant 1.000000e+00 : f32
    %76 = vector.broadcast %cst_26 : f32 to vector<32x128xf32>
    %77 = arith.subf %76, %69 : vector<32x128xf32>
    %78 = arith.mulf %77, %75 : vector<32x128xf32>
    %79 = arith.mulf %69, %46 : vector<32x128xf32>
    %80 = arith.addf %78, %79 : vector<32x128xf32>
    %c0_27 = arith.constant 0 : index
    %c0_28 = arith.constant 0 : index
    %81 = vector.load %arg5[%c0_27, %c0_28] : memref<32x128xf32, #tpu.memory_space<vmem>>, vector<32x128xf32>
    tpu.vector_store %arg5[%c0_27, %c0_28], %80 {strides = array<i32>} : memref<32x128xf32, #tpu.memory_space<vmem>>, vector<32x128xf32>,
    %82 = arith.truncf %80 : vector<32x128xf32> to vector<32x128xbf16>
    %83 = arith.index_cast %c1_i32 : i32 to index
    %c0_29 = arith.constant 0 : index
    %c0_30 = arith.constant 0 : index
    %84 = vector.load %arg4[%83, %c0_29, %c0_30] : memref<8x32x128xbf16, #tpu.memory_space<vmem>>, vector<1x32x128xbf16>
    %85 = vector.shape_cast %84 : vector<1x32x128xbf16> to vector<32x128xbf16>
    %86 = vector.shape_cast %82 : vector<32x128xbf16> to vector<1x32x128xbf16>
    tpu.vector_store %arg4[%83, %c0_29, %c0_30], %86 {strides = array<i32>} : memref<8x32x128xbf16, #tpu.memory_space<vmem>>, vector<1x32x128xbf16>,
    %c2_i32 = arith.constant 2 : i32
    %c0_31 = arith.constant 0 : index
    %c0_32 = arith.constant 0 : index
    %87 = vector.load %arg5[%c0_31, %c0_32] : memref<32x128xf32, #tpu.memory_space<vmem>>, vector<32x128xf32>
    %88 = arith.truncf %87 : vector<32x128xf32> to vector<32x128xbf16>
    %c0_33 = arith.constant 0 : index
    %c0_34 = arith.constant 0 : index
    %89 = vector.load %arg2[%c0_33, %c0_34] : memref<128x384xbf16, #tpu.memory_space<vmem>>, vector<128x384xbf16>
    %cst_35 = arith.constant dense<0.000000e+00> : vector<32x384xf32>
    %90 = tpu.matmul %88, %89, %cst_35 {dimension_numbers = #tpu.dot_dimension_numbers<[1], [0], [0], [1], [0, 0, 1, 1], [], []>} : vector<32x128xbf16>, vector<128x384xbf16>, vector<32x384xf32> -> vector<32x384xf32>
    %91 = arith.index_cast %c2_i32 : i32 to index
    %c0_36 = arith.constant 0 : index
    %c0_37 = arith.constant 0 : index
    %92 = vector.load %arg1[%91, %c0_36, %c0_37] : memref<8x32x384xbf16, #tpu.memory_space<vmem>>, vector<1x32x384xbf16>
    %93 = vector.shape_cast %92 : vector<1x32x384xbf16> to vector<32x384xbf16>
    %94 = arith.extf %93 : vector<32x384xbf16> to vector<32x384xf32>
    %95 = vector.extract_strided_slice %94 {offsets = [0, 0], sizes = [32, 128], strides = [1, 1]} : vector<32x384xf32> to vector<32x128xf32>
    %96 = vector.extract_strided_slice %90 {offsets = [0, 0], sizes = [32, 128], strides = [1, 1]} : vector<32x384xf32> to vector<32x128xf32>
    %97 = arith.addf %95, %96 : vector<32x128xf32>
    %98 = arith.negf %97 : vector<32x128xf32>
    %99 = math.exp %98 : vector<32x128xf32>
    %cst_38 = arith.constant 1.000000e+00 : f32
    %100 = vector.broadcast %cst_38 : f32 to vector<32x128xf32>
    %101 = arith.addf %100, %99 : vector<32x128xf32>
    %102 = arith.divf %100, %101 : vector<32x128xf32>
    %103 = vector.extract_strided_slice %94 {offsets = [0, 128], sizes = [32, 128], strides = [1, 1]} : vector<32x384xf32> to vector<32x128xf32>
    %104 = vector.extract_strided_slice %90 {offsets = [0, 128], sizes = [32, 128], strides = [1, 1]} : vector<32x384xf32> to vector<32x128xf32>
    %105 = arith.addf %103, %104 : vector<32x128xf32>
    %106 = arith.negf %105 : vector<32x128xf32>
    %107 = math.exp %106 : vector<32x128xf32>
    %cst_39 = arith.constant 1.000000e+00 : f32
    %108 = vector.broadcast %cst_39 : f32 to vector<32x128xf32>
    %109 = arith.addf %108, %107 : vector<32x128xf32>
    %110 = arith.divf %108, %109 : vector<32x128xf32>
    %111 = vector.extract_strided_slice %94 {offsets = [0, 256], sizes = [32, 128], strides = [1, 1]} : vector<32x384xf32> to vector<32x128xf32>
    %112 = vector.extract_strided_slice %90 {offsets = [0, 256], sizes = [32, 128], strides = [1, 1]} : vector<32x384xf32> to vector<32x128xf32>
    %113 = arith.addf %112, %4 : vector<32x128xf32>
    %114 = arith.mulf %102, %113 : vector<32x128xf32>
    %115 = arith.addf %111, %114 : vector<32x128xf32>
    %116 = math.tanh %115 : vector<32x128xf32>
    %cst_40 = arith.constant 1.000000e+00 : f32
    %117 = vector.broadcast %cst_40 : f32 to vector<32x128xf32>
    %118 = arith.subf %117, %110 : vector<32x128xf32>
    %119 = arith.mulf %118, %116 : vector<32x128xf32>
    %120 = arith.mulf %110, %87 : vector<32x128xf32>
    %121 = arith.addf %119, %120 : vector<32x128xf32>
    %c0_41 = arith.constant 0 : index
    %c0_42 = arith.constant 0 : index
    %122 = vector.load %arg5[%c0_41, %c0_42] : memref<32x128xf32, #tpu.memory_space<vmem>>, vector<32x128xf32>
    tpu.vector_store %arg5[%c0_41, %c0_42], %121 {strides = array<i32>} : memref<32x128xf32, #tpu.memory_space<vmem>>, vector<32x128xf32>,
    %123 = arith.truncf %121 : vector<32x128xf32> to vector<32x128xbf16>
    %124 = arith.index_cast %c2_i32 : i32 to index
    %c0_43 = arith.constant 0 : index
    %c0_44 = arith.constant 0 : index
    %125 = vector.load %arg4[%124, %c0_43, %c0_44] : memref<8x32x128xbf16, #tpu.memory_space<vmem>>, vector<1x32x128xbf16>
    %126 = vector.shape_cast %125 : vector<1x32x128xbf16> to vector<32x128xbf16>
    %127 = vector.shape_cast %123 : vector<32x128xbf16> to vector<1x32x128xbf16>
    tpu.vector_store %arg4[%124, %c0_43, %c0_44], %127 {strides = array<i32>} : memref<8x32x128xbf16, #tpu.memory_space<vmem>>, vector<1x32x128xbf16>,
    %c3_i32 = arith.constant 3 : i32
    %c0_45 = arith.constant 0 : index
    %c0_46 = arith.constant 0 : index
    %128 = vector.load %arg5[%c0_45, %c0_46] : memref<32x128xf32, #tpu.memory_space<vmem>>, vector<32x128xf32>
    %129 = arith.truncf %128 : vector<32x128xf32> to vector<32x128xbf16>
    %c0_47 = arith.constant 0 : index
    %c0_48 = arith.constant 0 : index
    %130 = vector.load %arg2[%c0_47, %c0_48] : memref<128x384xbf16, #tpu.memory_space<vmem>>, vector<128x384xbf16>
    %cst_49 = arith.constant dense<0.000000e+00> : vector<32x384xf32>
    %131 = tpu.matmul %129, %130, %cst_49 {dimension_numbers = #tpu.dot_dimension_numbers<[1], [0], [0], [1], [0, 0, 1, 1], [], []>} : vector<32x128xbf16>, vector<128x384xbf16>, vector<32x384xf32> -> vector<32x384xf32>
    %132 = arith.index_cast %c3_i32 : i32 to index
    %c0_50 = arith.constant 0 : index
    %c0_51 = arith.constant 0 : index
    %133 = vector.load %arg1[%132, %c0_50, %c0_51] : memref<8x32x384xbf16, #tpu.memory_space<vmem>>, vector<1x32x384xbf16>
    %134 = vector.shape_cast %133 : vector<1x32x384xbf16> to vector<32x384xbf16>
    %135 = arith.extf %134 : vector<32x384xbf16> to vector<32x384xf32>
    %136 = vector.extract_strided_slice %135 {offsets = [0, 0], sizes = [32, 128], strides = [1, 1]} : vector<32x384xf32> to vector<32x128xf32>
    %137 = vector.extract_strided_slice %131 {offsets = [0, 0], sizes = [32, 128], strides = [1, 1]} : vector<32x384xf32> to vector<32x128xf32>
    %138 = arith.addf %136, %137 : vector<32x128xf32>
    %139 = arith.negf %138 : vector<32x128xf32>
    %140 = math.exp %139 : vector<32x128xf32>
    %cst_52 = arith.constant 1.000000e+00 : f32
    %141 = vector.broadcast %cst_52 : f32 to vector<32x128xf32>
    %142 = arith.addf %141, %140 : vector<32x128xf32>
    %143 = arith.divf %141, %142 : vector<32x128xf32>
    %144 = vector.extract_strided_slice %135 {offsets = [0, 128], sizes = [32, 128], strides = [1, 1]} : vector<32x384xf32> to vector<32x128xf32>
    %145 = vector.extract_strided_slice %131 {offsets = [0, 128], sizes = [32, 128], strides = [1, 1]} : vector<32x384xf32> to vector<32x128xf32>
    %146 = arith.addf %144, %145 : vector<32x128xf32>
    %147 = arith.negf %146 : vector<32x128xf32>
    %148 = math.exp %147 : vector<32x128xf32>
    %cst_53 = arith.constant 1.000000e+00 : f32
    %149 = vector.broadcast %cst_53 : f32 to vector<32x128xf32>
    %150 = arith.addf %149, %148 : vector<32x128xf32>
    %151 = arith.divf %149, %150 : vector<32x128xf32>
    %152 = vector.extract_strided_slice %135 {offsets = [0, 256], sizes = [32, 128], strides = [1, 1]} : vector<32x384xf32> to vector<32x128xf32>
    %153 = vector.extract_strided_slice %131 {offsets = [0, 256], sizes = [32, 128], strides = [1, 1]} : vector<32x384xf32> to vector<32x128xf32>
    %154 = arith.addf %153, %4 : vector<32x128xf32>
    %155 = arith.mulf %143, %154 : vector<32x128xf32>
    %156 = arith.addf %152, %155 : vector<32x128xf32>
    %157 = math.tanh %156 : vector<32x128xf32>
    %cst_54 = arith.constant 1.000000e+00 : f32
    %158 = vector.broadcast %cst_54 : f32 to vector<32x128xf32>
    %159 = arith.subf %158, %151 : vector<32x128xf32>
    %160 = arith.mulf %159, %157 : vector<32x128xf32>
    %161 = arith.mulf %151, %128 : vector<32x128xf32>
    %162 = arith.addf %160, %161 : vector<32x128xf32>
    %c0_55 = arith.constant 0 : index
    %c0_56 = arith.constant 0 : index
    %163 = vector.load %arg5[%c0_55, %c0_56] : memref<32x128xf32, #tpu.memory_space<vmem>>, vector<32x128xf32>
    tpu.vector_store %arg5[%c0_55, %c0_56], %162 {strides = array<i32>} : memref<32x128xf32, #tpu.memory_space<vmem>>, vector<32x128xf32>,
    %164 = arith.truncf %162 : vector<32x128xf32> to vector<32x128xbf16>
    %165 = arith.index_cast %c3_i32 : i32 to index
    %c0_57 = arith.constant 0 : index
    %c0_58 = arith.constant 0 : index
    %166 = vector.load %arg4[%165, %c0_57, %c0_58] : memref<8x32x128xbf16, #tpu.memory_space<vmem>>, vector<1x32x128xbf16>
    %167 = vector.shape_cast %166 : vector<1x32x128xbf16> to vector<32x128xbf16>
    %168 = vector.shape_cast %164 : vector<32x128xbf16> to vector<1x32x128xbf16>
    tpu.vector_store %arg4[%165, %c0_57, %c0_58], %168 {strides = array<i32>} : memref<8x32x128xbf16, #tpu.memory_space<vmem>>, vector<1x32x128xbf16>,
    %c4_i32 = arith.constant 4 : i32
    %c0_59 = arith.constant 0 : index
    %c0_60 = arith.constant 0 : index
    %169 = vector.load %arg5[%c0_59, %c0_60] : memref<32x128xf32, #tpu.memory_space<vmem>>, vector<32x128xf32>
    %170 = arith.truncf %169 : vector<32x128xf32> to vector<32x128xbf16>
    %c0_61 = arith.constant 0 : index
    %c0_62 = arith.constant 0 : index
    %171 = vector.load %arg2[%c0_61, %c0_62] : memref<128x384xbf16, #tpu.memory_space<vmem>>, vector<128x384xbf16>
    %cst_63 = arith.constant dense<0.000000e+00> : vector<32x384xf32>
    %172 = tpu.matmul %170, %171, %cst_63 {dimension_numbers = #tpu.dot_dimension_numbers<[1], [0], [0], [1], [0, 0, 1, 1], [], []>} : vector<32x128xbf16>, vector<128x384xbf16>, vector<32x384xf32> -> vector<32x384xf32>
    %173 = arith.index_cast %c4_i32 : i32 to index
    %c0_64 = arith.constant 0 : index
    %c0_65 = arith.constant 0 : index
    %174 = vector.load %arg1[%173, %c0_64, %c0_65] : memref<8x32x384xbf16, #tpu.memory_space<vmem>>, vector<1x32x384xbf16>
    %175 = vector.shape_cast %174 : vector<1x32x384xbf16> to vector<32x384xbf16>
    %176 = arith.extf %175 : vector<32x384xbf16> to vector<32x384xf32>
    %177 = vector.extract_strided_slice %176 {offsets = [0, 0], sizes = [32, 128], strides = [1, 1]} : vector<32x384xf32> to vector<32x128xf32>
    %178 = vector.extract_strided_slice %172 {offsets = [0, 0], sizes = [32, 128], strides = [1, 1]} : vector<32x384xf32> to vector<32x128xf32>
    %179 = arith.addf %177, %178 : vector<32x128xf32>
    %180 = arith.negf %179 : vector<32x128xf32>
    %181 = math.exp %180 : vector<32x128xf32>
    %cst_66 = arith.constant 1.000000e+00 : f32
    %182 = vector.broadcast %cst_66 : f32 to vector<32x128xf32>
    %183 = arith.addf %182, %181 : vector<32x128xf32>
    %184 = arith.divf %182, %183 : vector<32x128xf32>
    %185 = vector.extract_strided_slice %176 {offsets = [0, 128], sizes = [32, 128], strides = [1, 1]} : vector<32x384xf32> to vector<32x128xf32>
    %186 = vector.extract_strided_slice %172 {offsets = [0, 128], sizes = [32, 128], strides = [1, 1]} : vector<32x384xf32> to vector<32x128xf32>
    %187 = arith.addf %185, %186 : vector<32x128xf32>
    %188 = arith.negf %187 : vector<32x128xf32>
    %189 = math.exp %188 : vector<32x128xf32>
    %cst_67 = arith.constant 1.000000e+00 : f32
    %190 = vector.broadcast %cst_67 : f32 to vector<32x128xf32>
    %191 = arith.addf %190, %189 : vector<32x128xf32>
    %192 = arith.divf %190, %191 : vector<32x128xf32>
    %193 = vector.extract_strided_slice %176 {offsets = [0, 256], sizes = [32, 128], strides = [1, 1]} : vector<32x384xf32> to vector<32x128xf32>
    %194 = vector.extract_strided_slice %172 {offsets = [0, 256], sizes = [32, 128], strides = [1, 1]} : vector<32x384xf32> to vector<32x128xf32>
    %195 = arith.addf %194, %4 : vector<32x128xf32>
    %196 = arith.mulf %184, %195 : vector<32x128xf32>
    %197 = arith.addf %193, %196 : vector<32x128xf32>
    %198 = math.tanh %197 : vector<32x128xf32>
    %cst_68 = arith.constant 1.000000e+00 : f32
    %199 = vector.broadcast %cst_68 : f32 to vector<32x128xf32>
    %200 = arith.subf %199, %192 : vector<32x128xf32>
    %201 = arith.mulf %200, %198 : vector<32x128xf32>
    %202 = arith.mulf %192, %169 : vector<32x128xf32>
    %203 = arith.addf %201, %202 : vector<32x128xf32>
    %c0_69 = arith.constant 0 : index
    %c0_70 = arith.constant 0 : index
    %204 = vector.load %arg5[%c0_69, %c0_70] : memref<32x128xf32, #tpu.memory_space<vmem>>, vector<32x128xf32>
    tpu.vector_store %arg5[%c0_69, %c0_70], %203 {strides = array<i32>} : memref<32x128xf32, #tpu.memory_space<vmem>>, vector<32x128xf32>,
    %205 = arith.truncf %203 : vector<32x128xf32> to vector<32x128xbf16>
    %206 = arith.index_cast %c4_i32 : i32 to index
    %c0_71 = arith.constant 0 : index
    %c0_72 = arith.constant 0 : index
    %207 = vector.load %arg4[%206, %c0_71, %c0_72] : memref<8x32x128xbf16, #tpu.memory_space<vmem>>, vector<1x32x128xbf16>
    %208 = vector.shape_cast %207 : vector<1x32x128xbf16> to vector<32x128xbf16>
    %209 = vector.shape_cast %205 : vector<32x128xbf16> to vector<1x32x128xbf16>
    tpu.vector_store %arg4[%206, %c0_71, %c0_72], %209 {strides = array<i32>} : memref<8x32x128xbf16, #tpu.memory_space<vmem>>, vector<1x32x128xbf16>,
    %c5_i32 = arith.constant 5 : i32
    %c0_73 = arith.constant 0 : index
    %c0_74 = arith.constant 0 : index
    %210 = vector.load %arg5[%c0_73, %c0_74] : memref<32x128xf32, #tpu.memory_space<vmem>>, vector<32x128xf32>
    %211 = arith.truncf %210 : vector<32x128xf32> to vector<32x128xbf16>
    %c0_75 = arith.constant 0 : index
    %c0_76 = arith.constant 0 : index
    %212 = vector.load %arg2[%c0_75, %c0_76] : memref<128x384xbf16, #tpu.memory_space<vmem>>, vector<128x384xbf16>
    %cst_77 = arith.constant dense<0.000000e+00> : vector<32x384xf32>
    %213 = tpu.matmul %211, %212, %cst_77 {dimension_numbers = #tpu.dot_dimension_numbers<[1], [0], [0], [1], [0, 0, 1, 1], [], []>} : vector<32x128xbf16>, vector<128x384xbf16>, vector<32x384xf32> -> vector<32x384xf32>
    %214 = arith.index_cast %c5_i32 : i32 to index
    %c0_78 = arith.constant 0 : index
    %c0_79 = arith.constant 0 : index
    %215 = vector.load %arg1[%214, %c0_78, %c0_79] : memref<8x32x384xbf16, #tpu.memory_space<vmem>>, vector<1x32x384xbf16>
    %216 = vector.shape_cast %215 : vector<1x32x384xbf16> to vector<32x384xbf16>
    %217 = arith.extf %216 : vector<32x384xbf16> to vector<32x384xf32>
    %218 = vector.extract_strided_slice %217 {offsets = [0, 0], sizes = [32, 128], strides = [1, 1]} : vector<32x384xf32> to vector<32x128xf32>
    %219 = vector.extract_strided_slice %213 {offsets = [0, 0], sizes = [32, 128], strides = [1, 1]} : vector<32x384xf32> to vector<32x128xf32>
    %220 = arith.addf %218, %219 : vector<32x128xf32>
    %221 = arith.negf %220 : vector<32x128xf32>
    %222 = math.exp %221 : vector<32x128xf32>
    %cst_80 = arith.constant 1.000000e+00 : f32
    %223 = vector.broadcast %cst_80 : f32 to vector<32x128xf32>
    %224 = arith.addf %223, %222 : vector<32x128xf32>
    %225 = arith.divf %223, %224 : vector<32x128xf32>
    %226 = vector.extract_strided_slice %217 {offsets = [0, 128], sizes = [32, 128], strides = [1, 1]} : vector<32x384xf32> to vector<32x128xf32>
    %227 = vector.extract_strided_slice %213 {offsets = [0, 128], sizes = [32, 128], strides = [1, 1]} : vector<32x384xf32> to vector<32x128xf32>
    %228 = arith.addf %226, %227 : vector<32x128xf32>
    %229 = arith.negf %228 : vector<32x128xf32>
    %230 = math.exp %229 : vector<32x128xf32>
    %cst_81 = arith.constant 1.000000e+00 : f32
    %231 = vector.broadcast %cst_81 : f32 to vector<32x128xf32>
    %232 = arith.addf %231, %230 : vector<32x128xf32>
    %233 = arith.divf %231, %232 : vector<32x128xf32>
    %234 = vector.extract_strided_slice %217 {offsets = [0, 256], sizes = [32, 128], strides = [1, 1]} : vector<32x384xf32> to vector<32x128xf32>
    %235 = vector.extract_strided_slice %213 {offsets = [0, 256], sizes = [32, 128], strides = [1, 1]} : vector<32x384xf32> to vector<32x128xf32>
    %236 = arith.addf %235, %4 : vector<32x128xf32>
    %237 = arith.mulf %225, %236 : vector<32x128xf32>
    %238 = arith.addf %234, %237 : vector<32x128xf32>
    %239 = math.tanh %238 : vector<32x128xf32>
    %cst_82 = arith.constant 1.000000e+00 : f32
    %240 = vector.broadcast %cst_82 : f32 to vector<32x128xf32>
    %241 = arith.subf %240, %233 : vector<32x128xf32>
    %242 = arith.mulf %241, %239 : vector<32x128xf32>
    %243 = arith.mulf %233, %210 : vector<32x128xf32>
    %244 = arith.addf %242, %243 : vector<32x128xf32>
    %c0_83 = arith.constant 0 : index
    %c0_84 = arith.constant 0 : index
    %245 = vector.load %arg5[%c0_83, %c0_84] : memref<32x128xf32, #tpu.memory_space<vmem>>, vector<32x128xf32>
    tpu.vector_store %arg5[%c0_83, %c0_84], %244 {strides = array<i32>} : memref<32x128xf32, #tpu.memory_space<vmem>>, vector<32x128xf32>,
    %246 = arith.truncf %244 : vector<32x128xf32> to vector<32x128xbf16>
    %247 = arith.index_cast %c5_i32 : i32 to index
    %c0_85 = arith.constant 0 : index
    %c0_86 = arith.constant 0 : index
    %248 = vector.load %arg4[%247, %c0_85, %c0_86] : memref<8x32x128xbf16, #tpu.memory_space<vmem>>, vector<1x32x128xbf16>
    %249 = vector.shape_cast %248 : vector<1x32x128xbf16> to vector<32x128xbf16>
    %250 = vector.shape_cast %246 : vector<32x128xbf16> to vector<1x32x128xbf16>
    tpu.vector_store %arg4[%247, %c0_85, %c0_86], %250 {strides = array<i32>} : memref<8x32x128xbf16, #tpu.memory_space<vmem>>, vector<1x32x128xbf16>,
    %c6_i32 = arith.constant 6 : i32
    %c0_87 = arith.constant 0 : index
    %c0_88 = arith.constant 0 : index
    %251 = vector.load %arg5[%c0_87, %c0_88] : memref<32x128xf32, #tpu.memory_space<vmem>>, vector<32x128xf32>
    %252 = arith.truncf %251 : vector<32x128xf32> to vector<32x128xbf16>
    %c0_89 = arith.constant 0 : index
    %c0_90 = arith.constant 0 : index
    %253 = vector.load %arg2[%c0_89, %c0_90] : memref<128x384xbf16, #tpu.memory_space<vmem>>, vector<128x384xbf16>
    %cst_91 = arith.constant dense<0.000000e+00> : vector<32x384xf32>
    %254 = tpu.matmul %252, %253, %cst_91 {dimension_numbers = #tpu.dot_dimension_numbers<[1], [0], [0], [1], [0, 0, 1, 1], [], []>} : vector<32x128xbf16>, vector<128x384xbf16>, vector<32x384xf32> -> vector<32x384xf32>
    %255 = arith.index_cast %c6_i32 : i32 to index
    %c0_92 = arith.constant 0 : index
    %c0_93 = arith.constant 0 : index
    %256 = vector.load %arg1[%255, %c0_92, %c0_93] : memref<8x32x384xbf16, #tpu.memory_space<vmem>>, vector<1x32x384xbf16>
    %257 = vector.shape_cast %256 : vector<1x32x384xbf16> to vector<32x384xbf16>
    %258 = arith.extf %257 : vector<32x384xbf16> to vector<32x384xf32>
    %259 = vector.extract_strided_slice %258 {offsets = [0, 0], sizes = [32, 128], strides = [1, 1]} : vector<32x384xf32> to vector<32x128xf32>
    %260 = vector.extract_strided_slice %254 {offsets = [0, 0], sizes = [32, 128], strides = [1, 1]} : vector<32x384xf32> to vector<32x128xf32>
    %261 = arith.addf %259, %260 : vector<32x128xf32>
    %262 = arith.negf %261 : vector<32x128xf32>
    %263 = math.exp %262 : vector<32x128xf32>
    %cst_94 = arith.constant 1.000000e+00 : f32
    %264 = vector.broadcast %cst_94 : f32 to vector<32x128xf32>
    %265 = arith.addf %264, %263 : vector<32x128xf32>
    %266 = arith.divf %264, %265 : vector<32x128xf32>
    %267 = vector.extract_strided_slice %258 {offsets = [0, 128], sizes = [32, 128], strides = [1, 1]} : vector<32x384xf32> to vector<32x128xf32>
    %268 = vector.extract_strided_slice %254 {offsets = [0, 128], sizes = [32, 128], strides = [1, 1]} : vector<32x384xf32> to vector<32x128xf32>
    %269 = arith.addf %267, %268 : vector<32x128xf32>
    %270 = arith.negf %269 : vector<32x128xf32>
    %271 = math.exp %270 : vector<32x128xf32>
    %cst_95 = arith.constant 1.000000e+00 : f32
    %272 = vector.broadcast %cst_95 : f32 to vector<32x128xf32>
    %273 = arith.addf %272, %271 : vector<32x128xf32>
    %274 = arith.divf %272, %273 : vector<32x128xf32>
    %275 = vector.extract_strided_slice %258 {offsets = [0, 256], sizes = [32, 128], strides = [1, 1]} : vector<32x384xf32> to vector<32x128xf32>
    %276 = vector.extract_strided_slice %254 {offsets = [0, 256], sizes = [32, 128], strides = [1, 1]} : vector<32x384xf32> to vector<32x128xf32>
    %277 = arith.addf %276, %4 : vector<32x128xf32>
    %278 = arith.mulf %266, %277 : vector<32x128xf32>
    %279 = arith.addf %275, %278 : vector<32x128xf32>
    %280 = math.tanh %279 : vector<32x128xf32>
    %cst_96 = arith.constant 1.000000e+00 : f32
    %281 = vector.broadcast %cst_96 : f32 to vector<32x128xf32>
    %282 = arith.subf %281, %274 : vector<32x128xf32>
    %283 = arith.mulf %282, %280 : vector<32x128xf32>
    %284 = arith.mulf %274, %251 : vector<32x128xf32>
    %285 = arith.addf %283, %284 : vector<32x128xf32>
    %c0_97 = arith.constant 0 : index
    %c0_98 = arith.constant 0 : index
    %286 = vector.load %arg5[%c0_97, %c0_98] : memref<32x128xf32, #tpu.memory_space<vmem>>, vector<32x128xf32>
    tpu.vector_store %arg5[%c0_97, %c0_98], %285 {strides = array<i32>} : memref<32x128xf32, #tpu.memory_space<vmem>>, vector<32x128xf32>,
    %287 = arith.truncf %285 : vector<32x128xf32> to vector<32x128xbf16>
    %288 = arith.index_cast %c6_i32 : i32 to index
    %c0_99 = arith.constant 0 : index
    %c0_100 = arith.constant 0 : index
    %289 = vector.load %arg4[%288, %c0_99, %c0_100] : memref<8x32x128xbf16, #tpu.memory_space<vmem>>, vector<1x32x128xbf16>
    %290 = vector.shape_cast %289 : vector<1x32x128xbf16> to vector<32x128xbf16>
    %291 = vector.shape_cast %287 : vector<32x128xbf16> to vector<1x32x128xbf16>
    tpu.vector_store %arg4[%288, %c0_99, %c0_100], %291 {strides = array<i32>} : memref<8x32x128xbf16, #tpu.memory_space<vmem>>, vector<1x32x128xbf16>,
    %c7_i32 = arith.constant 7 : i32
    %c0_101 = arith.constant 0 : index
    %c0_102 = arith.constant 0 : index
    %292 = vector.load %arg5[%c0_101, %c0_102] : memref<32x128xf32, #tpu.memory_space<vmem>>, vector<32x128xf32>
    %293 = arith.truncf %292 : vector<32x128xf32> to vector<32x128xbf16>
    %c0_103 = arith.constant 0 : index
    %c0_104 = arith.constant 0 : index
    %294 = vector.load %arg2[%c0_103, %c0_104] : memref<128x384xbf16, #tpu.memory_space<vmem>>, vector<128x384xbf16>
    %cst_105 = arith.constant dense<0.000000e+00> : vector<32x384xf32>
    %295 = tpu.matmul %293, %294, %cst_105 {dimension_numbers = #tpu.dot_dimension_numbers<[1], [0], [0], [1], [0, 0, 1, 1], [], []>} : vector<32x128xbf16>, vector<128x384xbf16>, vector<32x384xf32> -> vector<32x384xf32>
    %296 = arith.index_cast %c7_i32 : i32 to index
    %c0_106 = arith.constant 0 : index
    %c0_107 = arith.constant 0 : index
    %297 = vector.load %arg1[%296, %c0_106, %c0_107] : memref<8x32x384xbf16, #tpu.memory_space<vmem>>, vector<1x32x384xbf16>
    %298 = vector.shape_cast %297 : vector<1x32x384xbf16> to vector<32x384xbf16>
    %299 = arith.extf %298 : vector<32x384xbf16> to vector<32x384xf32>
    %300 = vector.extract_strided_slice %299 {offsets = [0, 0], sizes = [32, 128], strides = [1, 1]} : vector<32x384xf32> to vector<32x128xf32>
    %301 = vector.extract_strided_slice %295 {offsets = [0, 0], sizes = [32, 128], strides = [1, 1]} : vector<32x384xf32> to vector<32x128xf32>
    %302 = arith.addf %300, %301 : vector<32x128xf32>
    %303 = arith.negf %302 : vector<32x128xf32>
    %304 = math.exp %303 : vector<32x128xf32>
    %cst_108 = arith.constant 1.000000e+00 : f32
    %305 = vector.broadcast %cst_108 : f32 to vector<32x128xf32>
    %306 = arith.addf %305, %304 : vector<32x128xf32>
    %307 = arith.divf %305, %306 : vector<32x128xf32>
    %308 = vector.extract_strided_slice %299 {offsets = [0, 128], sizes = [32, 128], strides = [1, 1]} : vector<32x384xf32> to vector<32x128xf32>
    %309 = vector.extract_strided_slice %295 {offsets = [0, 128], sizes = [32, 128], strides = [1, 1]} : vector<32x384xf32> to vector<32x128xf32>
    %310 = arith.addf %308, %309 : vector<32x128xf32>
    %311 = arith.negf %310 : vector<32x128xf32>
    %312 = math.exp %311 : vector<32x128xf32>
    %cst_109 = arith.constant 1.000000e+00 : f32
    %313 = vector.broadcast %cst_109 : f32 to vector<32x128xf32>
    %314 = arith.addf %313, %312 : vector<32x128xf32>
    %315 = arith.divf %313, %314 : vector<32x128xf32>
    %316 = vector.extract_strided_slice %299 {offsets = [0, 256], sizes = [32, 128], strides = [1, 1]} : vector<32x384xf32> to vector<32x128xf32>
    %317 = vector.extract_strided_slice %295 {offsets = [0, 256], sizes = [32, 128], strides = [1, 1]} : vector<32x384xf32> to vector<32x128xf32>
    %318 = arith.addf %317, %4 : vector<32x128xf32>
    %319 = arith.mulf %307, %318 : vector<32x128xf32>
    %320 = arith.addf %316, %319 : vector<32x128xf32>
    %321 = math.tanh %320 : vector<32x128xf32>
    %cst_110 = arith.constant 1.000000e+00 : f32
    %322 = vector.broadcast %cst_110 : f32 to vector<32x128xf32>
    %323 = arith.subf %322, %315 : vector<32x128xf32>
    %324 = arith.mulf %323, %321 : vector<32x128xf32>
    %325 = arith.mulf %315, %292 : vector<32x128xf32>
    %326 = arith.addf %324, %325 : vector<32x128xf32>
    %c0_111 = arith.constant 0 : index
    %c0_112 = arith.constant 0 : index
    %327 = vector.load %arg5[%c0_111, %c0_112] : memref<32x128xf32, #tpu.memory_space<vmem>>, vector<32x128xf32>
    tpu.vector_store %arg5[%c0_111, %c0_112], %326 {strides = array<i32>} : memref<32x128xf32, #tpu.memory_space<vmem>>, vector<32x128xf32>,
    %328 = arith.truncf %326 : vector<32x128xf32> to vector<32x128xbf16>
    %329 = arith.index_cast %c7_i32 : i32 to index
    %c0_113 = arith.constant 0 : index
    %c0_114 = arith.constant 0 : index
    %330 = vector.load %arg4[%329, %c0_113, %c0_114] : memref<8x32x128xbf16, #tpu.memory_space<vmem>>, vector<1x32x128xbf16>
    %331 = vector.shape_cast %330 : vector<1x32x128xbf16> to vector<32x128xbf16>
    %332 = vector.shape_cast %328 : vector<32x128xbf16> to vector<1x32x128xbf16>
    tpu.vector_store %arg4[%329, %c0_113, %c0_114], %332 {strides = array<i32>} : memref<8x32x128xbf16, #tpu.memory_space<vmem>>, vector<1x32x128xbf16>,
    %c8_i32 = arith.constant 8 : i32
    return
  }
  func.func @transform_0(%arg0: i32) -> (i32, i32, i32) {
    %c0_i32 = arith.constant 0 : i32
    %c0_i32_0 = arith.constant 0 : i32
    %c0_i32_1 = arith.constant 0 : i32
    return %c0_i32, %arg0, %c0_i32_0 : i32, i32, i32
  }
  func.func @transform_1(%arg0: i32) -> (i32, i32) {
    %c0_i32 = arith.constant 0 : i32
    %c0_i32_0 = arith.constant 0 : i32
    %c0_i32_1 = arith.constant 0 : i32
    return %c0_i32, %c0_i32_0 : i32, i32
  }
  func.func @transform_2(%arg0: i32) -> (i32, i32) {
    %c0_i32 = arith.constant 0 : i32
    %c0_i32_0 = arith.constant 0 : i32
    %c0_i32_1 = arith.constant 0 : i32
    return %c0_i32, %c0_i32_0 : i32, i32
  }
  func.func @transform_3(%arg0: i32) -> (i32, i32, i32) {
    %c0_i32 = arith.constant 0 : i32
    %c0_i32_0 = arith.constant 0 : i32
    %c0_i32_1 = arith.constant 0 : i32
    return %c0_i32, %arg0, %c0_i32_0 : i32, i32, i32
  }
}

</mosaic_0001>

<bundles_post_ra>
// kernel: mul.14
= control target key start
LH: loop header
LB: loop body
LE: loop exit
PB: predicated region body
PF: predicated region fallthrough
CT: control target
= control target key end

     0   :  { %s34_s0 = inlined_call_operand.vmem [shape: f32[96], index: 0, kind: input, shape index: {}]   ;;  %s35_s1 = inlined_call_operand.vmem [shape: f32[96], index: 1, kind: input, shape index: {}]   ;;  %s36_s2 = inlined_call_operand.vmem [shape: f32[96], index: 2, kind: output, shape index: {}]  }
   0x1   :  { %v3_v0 = vld [vmem:[%s34_s0] sm:$0x1] }
   0x2   :  { %v4_v1 = vld [vmem:[%s35_s1] sm:$0x1] }
   0x3   :  { %v7_v2 = vmul.f32 %v4_v1, %v3_v0 }
   0x5   :  { %9 = vst [vmem:[%s36_s2] sm:$0x1] %v7_v2 }

// kernel: tgcn_emb_forward.1
= control target key start
LH: loop header
LB: loop body
LE: loop exit
PB: predicated region body
PF: predicated region fallthrough
CT: control target
= control target key end

     0   :  { %v4444_v1 = vmov 0   ;;  %v4445_v2 = vmov 0.0|0.0   ;;  %s5393_s1 = inlined_call_operand.vmem [shape: bf16[128,384], index: 1, kind: input, shape index: {}]   ;;  %s5394_s0 = inlined_call_operand.vmem [shape: bf16[8,32,384], index: 0, kind: input, shape index: {}]   ;;  %s5395_s2 = inlined_call_operand.vmem [shape: f32[1,128], index: 2, kind: input, shape index: {}]   ;;  %s5396_s3 = inlined_call_operand.vmem [shape: bf16[8,32,128], index: 3, kind: output, shape index: {}]  }
   0x1   :  { %v4469_v0 = vld [vmem:[%s5393_s1 + $0xac] ss:$12 sps:$4 sm:$0xff]   ;;  %224 = vmatprep.mubr.bf16.mxu0 %v4444_v1  ;;  %3840 = vmatprep.mubr.bf16.mxu1 %v4445_v2  ;;  %v4476_v3 = vld [vmem:[%s5393_s1 + $0xa8] ss:$12 sps:$4 sm:$0xff]   ;;  %v4488_v5 = vld [vmem:[%s5393_s1 + $0x90] ss:$12 sps:$4 sm:$0xff]  }
   0x2   :  { %192 = vmatprep.subr.bf16.mxu0 %v4469_v0  ;;  %v4482_v4 = vld [vmem:[%s5393_s1 + $0x94] ss:$12 sps:$4 sm:$0xff]   ;;  %v4494_v6 = vld [vmem:[%s5393_s1 + $0x7c] ss:$12 sps:$4 sm:$0xff]   ;;  %v4500_v7 = vld [vmem:[%s5393_s1 + $0x78] ss:$12 sps:$4 sm:$0xff]  }
   0x3   :  { %193 = vmatpush1.bf16.msra.mxu0 %v4476_v3  ;;  %v4506_v8 = vld [vmem:[%s5393_s1 + $0x64] ss:$12 sps:$4 sm:$0xff]   ;;  %v4515_v10 = vld [vmem:[%s5393_s1 + $0x60] ss:$12 sps:$4 sm:$0xff]   ;;  %v4533_v14 = vld [vmem:[%s5393_s1 + $0x48] ss:$12 sps:$4 sm:$0xff]  }
   0x4   :  { %194 = vmatprep.subr.bf16.mxu0 %v4482_v4  ;;  %v4006_v9 = vld [vmem:[%s5393_s1 + $0xb0] ss:$12 sps:$4 sm:$0xff]   ;;  %v4521_v11 = vld [vmem:[%s5393_s1 + $0x4c] ss:$12 sps:$4 sm:$0xff]   ;;  %v4539_v15 = vld [vmem:[%s5393_s1 + $0x34] ss:$12 sps:$4 sm:$0xff]  }
   0x5   :  { %3824 = vmatprep.subr.bf16.mxu1 %v4006_v9  ;;  %v4010_v12 = vld [vmem:[%s5393_s1 + $0x98] ss:$12 sps:$4 sm:$0xff]   ;;  %v4012_v13 = vld [vmem:[%s5393_s1 + $0x80] ss:$12 sps:$4 sm:$0xff]   ;;  %v4544_v16 = vld [vmem:[%s5393_s1 + $0x30] ss:$12 sps:$4 sm:$0xff]  }
   0x6   :  { %3825 = vmatpush3.bf16.msra.mxu1 %v4006_v9  ;;  %v4013_v17 = vld [vmem:[%s5393_s1 + $0x68] ss:$12 sps:$4 sm:$0xff]   ;;  %v4014_v19 = vld [vmem:[%s5393_s1 + $0x50] ss:$12 sps:$4 sm:$0xff]   ;;  %v4562_v20 = vld [vmem:[%s5393_s1 + $0x18] ss:$12 sps:$4 sm:$0xff]  }
   0x7   :  { %195 = vmatpush1.bf16.msra.mxu0 %v4488_v5  ;;  %3826 = vmatprep.subr.bf16.mxu1 %v4010_v12  ;;  %v4552_v18 = vld [vmem:[%s5393_s1 + $0x1c] ss:$12 sps:$4 sm:$0xff]   ;;  %v4567_v21 = vld [vmem:[%s5393_s1 + $0x4] ss:$12 sps:$4 sm:$0xff]   ;;  %v4577_v23 = vld [vmem:[%s5393_s1] ss:$12 sps:$4 sm:$0xff]  }
   0x8   :  { %196 = vmatprep.subr.bf16.mxu0 %v4494_v6  ;;  %v4015_v22 = vld [vmem:[%s5393_s1 + $0x38] ss:$12 sps:$4 sm:$0xff]   ;;  %v4016_v24 = vld [vmem:[%s5393_s1 + $0x20] ss:$12 sps:$4 sm:$0xff]   ;;  %v4017_v25 = vld [vmem:[%s5393_s1 + $0x8] ss:$12 sps:$4 sm:$0xff]  }
   0x9   :  { %v4018_v26 = vld [vmem:[%s5393_s1 + $0xb0] ss:$12 sps:$4 sm:$0xff]   ;;  %v4019_v27 = vld [vmem:[%s5393_s1 + $0x98] ss:$12 sps:$4 sm:$0xff]   ;;  %v4020_v28 = vld [vmem:[%s5393_s1 + $0x80] ss:$12 sps:$4 sm:$0xff]  }
   0xa   :  { %3827 = vmatpush3.bf16.msra.mxu1 %v4010_v12  ;;  %v4021_v29 = vld [vmem:[%s5393_s1 + $0x68] ss:$12 sps:$4 sm:$0xff]   ;;  %v4022_v30 = vld [vmem:[%s5393_s1 + $0x50] ss:$12 sps:$4 sm:$0xff]   ;;  %v4023_v31 = vld [vmem:[%s5393_s1 + $0x38] ss:$12 sps:$4 sm:$0xff]  }
   0xb   :  { %197 = vmatpush1.bf16.msra.mxu0 %v4500_v7  ;;  %3828 = vmatprep.subr.bf16.mxu1 %v4012_v13  ;;  %v4024_v32 = vld [vmem:[%s5393_s1 + $0x20] ss:$12 sps:$4 sm:$0xff]   ;;  %v4025_v33 = vld [vmem:[%s5393_s1 + $0x8] ss:$12 sps:$4 sm:$0xff]   ;;  %v298_v41 = vld [vmem:[%s5394_s0 + $0x18] sm:$0xff] }
   0xc   :  { %198 = vmatprep.subr.bf16.mxu0 %v4506_v8  ;;  %v294_v34 = vld [vmem:[%s5394_s0] sm:$0xff]  ;;  %v296_v36 = vld [vmem:[%s5394_s0 + $0xc] sm:$0xff]  ;;  %v308_v46 = vunpack.c.l.bf16 %v298_v41  ;;  %v309_v59 = vunpack.c.h.bf16 %v298_v41 }
   0xd   :  { %v302_v35 = vunpack.c.l.bf16 %v294_v34  ;;  %v305_v39 = vunpack.c.l.bf16 %v296_v36  ;;  %v303_v43 = vunpack.c.h.bf16 %v294_v34  ;;  %v306_v48 = vunpack.c.h.bf16 %v296_v36  ;;  %v300_v49 = vld [vmem:[%s5394_s0 + $0x24] sm:$0xff] }
   0xe   :  { %3829 = vmatpush3.bf16.msra.mxu1 %v4012_v13  ;;  %v311_v54 = vunpack.c.l.bf16 %v300_v49  ;;  %v312_v63 = vunpack.c.h.bf16 %v300_v49 }
   0xf   :  { %199 = vmatpush1.bf16.msra.mxu0 %v4515_v10  ;;  %3830 = vmatprep.subr.bf16.mxu1 %v4013_v17 }
  0x10   :  { %200 = vmatprep.subr.bf16.mxu0 %v4521_v11 }
  0x12   :  { %3831 = vmatpush3.bf16.msra.mxu1 %v4013_v17 }
  0x13   :  { %201 = vmatpush1.bf16.msra.mxu0 %v4533_v14  ;;  %3832 = vmatprep.subr.bf16.mxu1 %v4014_v19 }
  0x14   :  { %202 = vmatprep.subr.bf16.mxu0 %v4539_v15 }
  0x16   :  { %3833 = vmatpush3.bf16.msra.mxu1 %v4014_v19 }
  0x17   :  { %203 = vmatpush1.bf16.msra.mxu0 %v4544_v16  ;;  %3834 = vmatprep.subr.bf16.mxu1 %v4015_v22 }
  0x18   :  { %204 = vmatprep.subr.bf16.mxu0 %v4552_v18 }
  0x1a   :  { %3835 = vmatpush3.bf16.msra.mxu1 %v4015_v22 }
  0x1b   :  { %205 = vmatpush1.bf16.msra.mxu0 %v4562_v20  ;;  %3836 = vmatprep.subr.bf16.mxu1 %v4016_v24 }
  0x1c   :  { %206 = vmatprep.subr.bf16.mxu0 %v4567_v21 }
  0x1e   :  { %3837 = vmatpush3.bf16.msra.mxu1 %v4016_v24 }
  0x1f   :  { %207 = vmatpush1.bf16.msra.mxu0 %v4577_v23  ;;  %3838 = vmatprep.subr.bf16.mxu1 %v4017_v25 }
  0x20   :  { %592 = vmatprep.subr.bf16.mxu0 %v4469_v0 }
  0x22   :  { %225 = vmatmul.mubr.bf16.vlgmr.msra.gmra.mxu0 %v4445_v2  ;;  %3839 = vmatpush3.bf16.msra.mxu1 %v4017_v25 }
  0x23   :  { %234 = vmatprep.mubr.bf16.mxu0 %v4444_v1  ;;  %593 = vmatpush1.bf16.msra.mxu0 %v4476_v3 }
  0x24   :  { %594 = vmatprep.subr.bf16.mxu0 %v4482_v4  ;;  %3844 = vmatprep.subr.bf16.mxu1 %v4018_v26 }
  0x25   :  { %3841 = vmatmul.mubr.bf16.vlgmr.msra.gmra.mxu1 %v4445_v2 }
  0x26   :  { %3845 = vmatpush3.bf16.msra.mxu1 %v4018_v26 }
  0x27   :  { %595 = vmatpush1.bf16.msra.mxu0 %v4488_v5  ;;  %3846 = vmatprep.subr.bf16.mxu1 %v4019_v27 }
  0x28   :  { %596 = vmatprep.subr.bf16.mxu0 %v4494_v6 }
  0x2a   :  { %235 = vmatmul.mubr.bf16.gmra.mxu0 %v4445_v2  ;;  %3847 = vmatpush3.bf16.msra.mxu1 %v4019_v27 }
  0x2b   :  { %597 = vmatpush1.bf16.msra.mxu0 %v4500_v7  ;;  %624 = vmatprep.mubr.bf16.mxu0 %v4444_v1 }
  0x2c   :  { %598 = vmatprep.subr.bf16.mxu0 %v4506_v8  ;;  %3848 = vmatprep.subr.bf16.mxu1 %v4020_v28 }
  0x2e   :  { %3849 = vmatpush3.bf16.msra.mxu1 %v4020_v28 }
  0x2f   :  { %599 = vmatpush1.bf16.msra.mxu0 %v4515_v10  ;;  %3850 = vmatprep.subr.bf16.mxu1 %v4021_v29 }
  0x30   :  { %600 = vmatprep.subr.bf16.mxu0 %v4521_v11 }
  0x32   :  { %3851 = vmatpush3.bf16.msra.mxu1 %v4021_v29 }
  0x33   :  { %601 = vmatpush1.bf16.msra.mxu0 %v4533_v14  ;;  %3852 = vmatprep.subr.bf16.mxu1 %v4022_v30 }
  0x34   :  { %602 = vmatprep.subr.bf16.mxu0 %v4539_v15 }
  0x36   :  { %3853 = vmatpush3.bf16.msra.mxu1 %v4022_v30 }
  0x37   :  { %603 = vmatpush1.bf16.msra.mxu0 %v4544_v16  ;;  %3854 = vmatprep.subr.bf16.mxu1 %v4023_v31 }
  0x38   :  { %604 = vmatprep.subr.bf16.mxu0 %v4552_v18 }
  0x3a   :  { %3855 = vmatpush3.bf16.msra.mxu1 %v4023_v31 }
  0x3b   :  { %605 = vmatpush1.bf16.msra.mxu0 %v4562_v20  ;;  %3856 = vmatprep.subr.bf16.mxu1 %v4024_v32 }
  0x3c   :  { %606 = vmatprep.subr.bf16.mxu0 %v4567_v21 }
  0x3e   :  { %3857 = vmatpush3.bf16.msra.mxu1 %v4024_v32  ;;  %v4649_v32 = vld [vmem:[%s5395_s2] ss:$0 sm:$0xff] }
  0x3f   :  { %607 = vmatpush1.bf16.msra.mxu0 %v4577_v23  ;;  %3858 = vmatprep.subr.bf16.mxu1 %v4025_v33 }
  0x40   :  { %994 = vmatprep.subr.bf16.mxu0 %v4469_v0 }
  0x42   :  { %3859 = vmatpush3.bf16.msra.mxu1 %v4025_v33  ;;  %v299_v33 = vld [vmem:[%s5394_s0 + $0x8] ss:$24 sps:$4 sm:$0xff]  }
  0xe2   :  { %v226_v37 = vpop.f32.mrf.mxu0 }
  0xe3   :  { %v314_v38 = vadd.f32 %v302_v35, %v226_v37 }
  0xe4   :  { %v228_v40 = vpop.f32.mrf.mxu0 }
  0xe5   :  { %v3269_v42 = vmul.f32 -1.442695, %v314_v38  ;;  %v342_v51 = vadd.f32 %v303_v43, %v228_v40  ;;  %v3842_v25 = vpop.f32.mrf.mxu1  ;;  %v304_v38 = vunpack.c.l.bf16 %v299_v33 }
  0xe6   :  { %v230_v44 = vpop.f32.mrf.mxu0 }
  0xe7   :  { %4122 = vpow2.f32 %v3269_v42  ;;  %v315_v45 = vadd.f32 %v305_v39, %v230_v44  ;;  %v3273_v58 = vmul.f32 -1.442695, %v342_v51  ;;  %v279_v28 = vpop.f32.mrf.mxu1  ;;  %v301_v42 = vld [vmem:[%s5394_s0 + $0x14] ss:$24 sps:$4 sm:$0xff]  }
  0xe8   :  { %v232_v47 = vpop.f32.mrf.mxu0  ;;  %v370_v39 = vadd.f32 %v4649_v32, %v279_v28 }
  0xe9   :  { %v3270_v50 = vmul.f32 -1.442695, %v315_v45  ;;  %v343_v55 = vadd.f32 %v306_v48, %v232_v47  ;;  %v3843_v34 = vpop.f32.mrf.mxu1  ;;  %v307_v47 = vunpack.c.l.bf16 %v301_v42 }
  0xea   :  { %v236_v52 = vpop.f32.mrf.mxu0 }
  0xeb   :  { %4124 = vpow2.f32 %v3270_v50  ;;  %v316_v53 = vadd.f32 %v308_v46, %v236_v52  ;;  %v3274_v62 = vmul.f32 -1.442695, %v343_v55  ;;  %v282_v43 = vpop.f32.mrf.mxu1 }
  0xec   :  { %v238_v56 = vpop.f32.mrf.mxu0  ;;  %v371_v48 = vadd.f32 %v4649_v32, %v282_v43 }
  0xed   :  { %v3271_v57 = vmul.f32 -1.442695, %v316_v53  ;;  %v344_v9 = vadd.f32 %v309_v59, %v238_v56  ;;  %v310_v53 = vunpack.c.h.bf16 %v299_v33 }
  0xee   :  { %v240_v60 = vpop.f32.mrf.mxu0 }
  0xef   :  { %4126 = vpow2.f32 %v3271_v57  ;;  %v317_v61 = vadd.f32 %v311_v54, %v240_v60  ;;  %v3275_v19 = vmul.f32 -1.442695, %v344_v9  ;;  %v372_v54 = vadd.f32 %v3842_v25, %v4649_v32 }
  0xf0   :  { %v242_v2 = vpop.f32.mrf.mxu0  ;;  %4128 = vpow2.f32 %v3273_v58  ;;  %v313_v60 = vunpack.c.h.bf16 %v301_v42 }
  0xf1   :  { %v3272_v0 = vmul.f32 -1.442695, %v317_v61  ;;  %v345_v13 = vadd.f32 %v312_v63, %v242_v2  ;;  %v373_v61 = vadd.f32 %v3843_v34, %v4649_v32 }
  0xf3   :  { %4130 = vpow2.f32 %v3272_v0  ;;  %v3276_v24 = vmul.f32 -1.442695, %v345_v13 }
  0xf4   :  { %v4123_v12 = vpop.eup %4122  ;;  %4132 = vpow2.f32 %v3274_v62 }
  0xf5   :  { %v330_v17 = vadd.f32 1.0, %v4123_v12 }
  0xf7   :  { %4134 = vrcp.f32 %v330_v17 }
  0xf8   :  { %v4125_v22 = vpop.eup %4124  ;;  %4136 = vpow2.f32 %v3275_v19 }
  0xf9   :  { %v331_v26 = vadd.f32 1.0, %v4125_v22 }
  0xfb   :  { %4138 = vrcp.f32 %v331_v26 }
  0xfc   :  { %v4127_v27 = vpop.eup %4126  ;;  %4140 = vpow2.f32 %v3276_v24 }
  0xfd   :  { %v332_v29 = vadd.f32 1.0, %v4127_v27  ;;  %v4129_v30 = vpop.eup %4128 }
  0xfe   :  { %v358_v37 = vadd.f32 1.0, %v4129_v30 }
  0xff   :  { %4142 = vrcp.f32 %v332_v29 }
 0x100   :  { %v4131_v31 = vpop.eup %4130 }
 0x101   :  { %v4133_v35 = vpop.eup %4132  ;;  %v333_v36 = vadd.f32 1.0, %v4131_v31 }
 0x102   :  { %v359_v41 = vadd.f32 1.0, %v4133_v35 }
 0x103   :  { %4144 = vrcp.f32 %v333_v36 }
 0x104   :  { %v4135_v40 = vpop.eup %4134  ;;  %4146 = vrcp.f32 %v358_v37 }
 0x105   :  { %v374_v44 = vmul.f32 %v4135_v40, %v370_v39  ;;  %v4137_v45 = vpop.eup %4136  ;;  %4148 = vrcp.f32 %v359_v41 }
 0x106   :  { %v360_v52 = vadd.f32 1.0, %v4137_v45 }
 0x107   :  { %v378_v46 = vadd.f32 %v374_v44, %v304_v38  ;;  %v3309_v44 = vld [vmem:[%s5394_s0 + $0x48] sm:$0xff] }
 0x108   :  { %v4139_v49 = vpop.eup %4138 }
 0x109   :  { %v4141_v50 = vpop.eup %4140  ;;  %4150 = vtanh.f32 %v378_v46  ;;  %v375_v51 = vmul.f32 %v4139_v49, %v371_v48  ;;  %v709_v49 = vunpack.c.l.bf16 %v3309_v44 }
 0x10a   :  { %v361_v57 = vadd.f32 1.0, %v4141_v50 }
 0x10b   :  { %v379_v55 = vadd.f32 %v375_v51, %v307_v47 }
 0x10c   :  { %v4143_v56 = vpop.eup %4142 }
 0x10d   :  { %v376_v58 = vmul.f32 %v4143_v56, %v372_v54  ;;  %4152 = vtanh.f32 %v379_v55 }
 0x10e   :  { %4154 = vrcp.f32 %v360_v52  ;;  %v3311_v52 = vld [vmem:[%s5394_s0 + $0x54] sm:$0xff] }
 0x10f   :  { %v380_v59 = vadd.f32 %v376_v58, %v310_v53  ;;  %4156 = vrcp.f32 %v361_v57  ;;  %v712_v57 = vunpack.c.l.bf16 %v3311_v52 }
 0x110   :  { %v4145_v62 = vpop.eup %4144 }
 0x111   :  { %4158 = vtanh.f32 %v380_v59  ;;  %v377_v63 = vmul.f32 %v4145_v62, %v373_v61  ;;  %v4147_v2 = vpop.eup %4146  ;;  %v710_v62 = vunpack.c.h.bf16 %v3309_v44 }
 0x112   :  { %v4149_v9 = vpop.eup %4148  ;;  %v386_v13 = vsub.f32 1.0, %v4147_v2  ;;  %v394_v25 = vmul.f32 0.0, %v4147_v2 }
 0x113   :  { %v381_v0 = vadd.f32 %v377_v63, %v313_v60  ;;  %v387_v17 = vsub.f32 1.0, %v4149_v9  ;;  %v395_v26 = vmul.f32 0.0, %v4149_v9  ;;  %v713_v9 = vunpack.c.h.bf16 %v3311_v52 }
 0x115   :  { %4160 = vtanh.f32 %v381_v0 }
 0x116   :  { %v4151_v12 = vpop.eup %4150 }
 0x117   :  { %v390_v19 = vmul.f32 %v4151_v12, %v386_v13 }
 0x119   :  { %v4661_v29 = vadd.f32 %v394_v25, %v390_v19 }
 0x11a   :  { %v4153_v22 = vpop.eup %4152 }
 0x11b   :  { %v391_v24 = vmul.f32 %v4153_v22, %v387_v17  ;;  %v4155_v27 = vpop.eup %4154 }
 0x11c   :  { %v4157_v28 = vpop.eup %4156  ;;  %v388_v34 = vsub.f32 1.0, %v4155_v27  ;;  %v396_v39 = vmul.f32 0.0, %v4155_v27 }
 0x11d   :  { %v4663_v30 = vadd.f32 %v395_v26, %v391_v24  ;;  %v389_v35 = vsub.f32 1.0, %v4157_v28  ;;  %v397_v40 = vmul.f32 0.0, %v4157_v28 }
 0x11e   :  { %v4159_v31 = vpop.eup %4158 }
 0x11f   :  { %v3652_v33 = vpack.c.bf16 %v4663_v30, %v4661_v29  ;;  %v392_v36 = vmul.f32 %v4159_v31, %v388_v34 }
 0x121   :  { %3653 = vst [vmem:[%s5396_s3] sm:$0xff] %v3652_v33   ;;  %625 = vmatmul.mubr.bf16.vlgmr.msra.gmra.mxu0 %v3652_v33  ;;  %3860 = vmatprep.mubr.bf16.mxu1 %v3652_v33  ;;  %v4673_v41 = vadd.f32 %v396_v39, %v392_v36 }
 0x122   :  { %v4161_v37 = vpop.eup %4160  ;;  %634 = vmatprep.mubr.bf16.mxu0 %v4444_v1  ;;  %995 = vmatpush1.bf16.msra.mxu0 %v4476_v3  ;;  %v4026_v3 = vld [vmem:[%s5393_s1 + $0xb0] ss:$12 sps:$4 sm:$0xff]  }
 0x123   :  { %v393_v38 = vmul.f32 %v4161_v37, %v389_v35  ;;  %996 = vmatprep.subr.bf16.mxu0 %v4482_v4  ;;  %3864 = vmatprep.subr.bf16.mxu1 %v4026_v3  ;;  %v4027_v4 = vld [vmem:[%s5393_s1 + $0x98] ss:$12 sps:$4 sm:$0xff]  }
 0x125   :  { %v4675_v42 = vadd.f32 %v397_v40, %v393_v38  ;;  %v3310_v38 = vld [vmem:[%s5394_s0 + $0x38] ss:$24 sps:$4 sm:$0xff]  }
 0x126   :  { %997 = vmatpush1.bf16.msra.mxu0 %v4488_v5  ;;  %v4028_v5 = vld [vmem:[%s5393_s1 + $0x80] ss:$12 sps:$4 sm:$0xff]   ;;  %v711_v44 = vunpack.c.h.bf16 %v3310_v38 }
 0x127   :  { %v3657_v43 = vpack.c.bf16 %v4675_v42, %v4673_v41  ;;  %998 = vmatprep.subr.bf16.mxu0 %v4494_v6  ;;  %v4029_v6 = vld [vmem:[%s5393_s1 + $0x68] ss:$12 sps:$4 sm:$0xff]  }
 0x129   :  { %3729 = vst [vmem:[%s5396_s3 + $0x8] sm:$0xff] %v3657_v43   ;;  %635 = vmatmul.mubr.bf16.gmra.mxu0 %v3657_v43  ;;  %3861 = vmatmul.mubr.bf16.vlgmr.msra.gmra.mxu1 %v3657_v43 }
 0x12a   :  { %999 = vmatpush1.bf16.msra.mxu0 %v4500_v7  ;;  %1026 = vmatprep.mubr.bf16.mxu0 %v4444_v1  ;;  %v4030_v7 = vld [vmem:[%s5393_s1 + $0x50] ss:$12 sps:$4 sm:$0xff]  }
 0x12b   :  { %1000 = vmatprep.subr.bf16.mxu0 %v4506_v8  ;;  %3865 = vmatpush3.bf16.msra.mxu1 %v4026_v3  ;;  %v4031_v8 = vld [vmem:[%s5393_s1 + $0x38] ss:$12 sps:$4 sm:$0xff]  }
 0x12c   :  { %3866 = vmatprep.subr.bf16.mxu1 %v4027_v4 }
 0x12e   :  { %1001 = vmatpush1.bf16.msra.mxu0 %v4515_v10  ;;  %v4032_v10 = vld [vmem:[%s5393_s1 + $0x20] ss:$12 sps:$4 sm:$0xff]  }
 0x12f   :  { %1002 = vmatprep.subr.bf16.mxu0 %v4521_v11  ;;  %3867 = vmatpush3.bf16.msra.mxu1 %v4027_v4  ;;  %v4033_v11 = vld [vmem:[%s5393_s1 + $0x8] ss:$12 sps:$4 sm:$0xff]   ;;  %v705_v4 = vunpack.c.l.bf16 %v3310_v38 }
 0x130   :  { %3868 = vmatprep.subr.bf16.mxu1 %v4028_v5  ;;  %v4793_v38 = vld [vmem:[%s5393_s1 + $0x7c] ss:$12 sps:$4 sm:$0xff]  }
 0x132   :  { %1003 = vmatpush1.bf16.msra.mxu0 %v4533_v14  ;;  %v3305_v14 = vld [vmem:[%s5394_s0 + $0x30] sm:$0xff] }
 0x133   :  { %1004 = vmatprep.subr.bf16.mxu0 %v4539_v15  ;;  %3869 = vmatpush3.bf16.msra.mxu1 %v4028_v5  ;;  %v703_v15 = vunpack.c.l.bf16 %v3305_v14  ;;  %v704_v46 = vunpack.c.h.bf16 %v3305_v14 }
 0x134   :  { %3870 = vmatprep.subr.bf16.mxu1 %v4029_v6 }
 0x136   :  { %1005 = vmatpush1.bf16.msra.mxu0 %v4544_v16  ;;  %v3307_v16 = vld [vmem:[%s5394_s0 + $0x3c] sm:$0xff] }
 0x137   :  { %1006 = vmatprep.subr.bf16.mxu0 %v4552_v18  ;;  %3871 = vmatpush3.bf16.msra.mxu1 %v4029_v6  ;;  %v707_v51 = vunpack.c.h.bf16 %v3307_v16 }
 0x138   :  { %3872 = vmatprep.subr.bf16.mxu1 %v4030_v7 }
 0x13a   :  { %1007 = vmatpush1.bf16.msra.mxu0 %v4562_v20 }
 0x13b   :  { %1008 = vmatprep.subr.bf16.mxu0 %v4567_v21  ;;  %3873 = vmatpush3.bf16.msra.mxu1 %v4030_v7  ;;  %v706_v21 = vunpack.c.l.bf16 %v3307_v16 }
 0x13c   :  { %3874 = vmatprep.subr.bf16.mxu1 %v4031_v8 }
 0x13e   :  { %1009 = vmatpush1.bf16.msra.mxu0 %v4577_v23 }
 0x13f   :  { %3875 = vmatpush3.bf16.msra.mxu1 %v4031_v8  ;;  %v3312_v8 = vld [vmem:[%s5394_s0 + $0x44] ss:$24 sps:$4 sm:$0xff]  }
 0x140   :  { %3876 = vmatprep.subr.bf16.mxu1 %v4032_v10  ;;  %v708_v16 = vunpack.c.l.bf16 %v3312_v8  ;;  %v714_v52 = vunpack.c.h.bf16 %v3312_v8  ;;  %v4838_v8 = vld [vmem:[%s5393_s1 + $0x34] ss:$12 sps:$4 sm:$0xff]  }
 0x143   :  { %3877 = vmatpush3.bf16.msra.mxu1 %v4032_v10 }
 0x144   :  { %3878 = vmatprep.subr.bf16.mxu1 %v4033_v11 }
 0x147   :  { %3879 = vmatpush3.bf16.msra.mxu1 %v4033_v11 }
 0x1e1   :  { %v626_v18 = vpop.f32.mrf.mxu0 }
 0x1e2   :  { %v715_v20 = vadd.f32 %v703_v15, %v626_v18 }
 0x1e3   :  { %v628_v23 = vpop.f32.mrf.mxu0 }
 0x1e4   :  { %v3313_v45 = vmul.f32 -1.442695, %v715_v20  ;;  %v743_v54 = vadd.f32 %v704_v46, %v628_v23 }
 0x1e5   :  { %v630_v47 = vpop.f32.mrf.mxu0 }
 0x1e6   :  { %4162 = vpow2.f32 %v3313_v45  ;;  %v716_v48 = vadd.f32 %v706_v21, %v630_v47  ;;  %v3317_v61 = vmul.f32 -1.442695, %v743_v54 }
 0x1e7   :  { %v632_v50 = vpop.f32.mrf.mxu0 }
 0x1e8   :  { %v3314_v53 = vmul.f32 -1.442695, %v716_v48  ;;  %v744_v58 = vadd.f32 %v707_v51, %v632_v50 }
 0x1e9   :  { %v636_v55 = vpop.f32.mrf.mxu0  ;;  %v3862_v27 = vpop.f32.mrf.mxu1 }
 0x1ea   :  { %4164 = vpow2.f32 %v3314_v53  ;;  %v717_v56 = vadd.f32 %v709_v49, %v636_v55  ;;  %v3318_v2 = vmul.f32 -1.442695, %v744_v58  ;;  %v773_v45 = vadd.f32 %v3862_v27, %v4649_v32 }
 0x1eb   :  { %v638_v59 = vpop.f32.mrf.mxu0  ;;  %v679_v34 = vpop.f32.mrf.mxu1 }
 0x1ec   :  { %v3315_v60 = vmul.f32 -1.442695, %v717_v56  ;;  %v745_v17 = vadd.f32 %v710_v62, %v638_v59  ;;  %v771_v5 = vadd.f32 %v4649_v32, %v679_v34 }
 0x1ed   :  { %v640_v63 = vpop.f32.mrf.mxu0  ;;  %v3863_v39 = vpop.f32.mrf.mxu1 }
 0x1ee   :  { %4166 = vpow2.f32 %v3315_v60  ;;  %v718_v0 = vadd.f32 %v712_v57, %v640_v63  ;;  %v3319_v25 = vmul.f32 -1.442695, %v745_v17  ;;  %v774_v53 = vadd.f32 %v3863_v39, %v4649_v32  ;;  %v4043_v39 = vld [vmem:[%s5393_s1 + $0xb0] ss:$12 sps:$4 sm:$0xff]  }
 0x1ef   :  { %v642_v13 = vpop.f32.mrf.mxu0  ;;  %4168 = vpow2.f32 %v3317_v61  ;;  %v682_v10 = vpop.f32.mrf.mxu1  ;;  %3884 = vmatprep.subr.bf16.mxu1 %v4043_v39 }
 0x1f0   :  { %v3316_v12 = vmul.f32 -1.442695, %v718_v0  ;;  %v746_v22 = vadd.f32 %v713_v9, %v642_v13  ;;  %v772_v18 = vadd.f32 %v4649_v32, %v682_v10  ;;  %v4055_v10 = vld [vmem:[%s5393_s1 + $0x68] ss:$12 sps:$4 sm:$0xff]  }
 0x1f2   :  { %4170 = vpow2.f32 %v3316_v12  ;;  %v3320_v28 = vmul.f32 -1.442695, %v746_v22 }
 0x1f3   :  { %v4163_v19 = vpop.eup %4162  ;;  %4172 = vpow2.f32 %v3318_v2 }
 0x1f4   :  { %v731_v24 = vadd.f32 1.0, %v4163_v19 }
 0x1f6   :  { %4174 = vrcp.f32 %v731_v24 }
 0x1f7   :  { %v4165_v26 = vpop.eup %4164  ;;  %4176 = vpow2.f32 %v3319_v25 }
 0x1f8   :  { %v732_v31 = vadd.f32 1.0, %v4165_v26 }
 0x1fa   :  { %4178 = vrcp.f32 %v732_v31 }
 0x1fb   :  { %v4167_v33 = vpop.eup %4166  ;;  %4180 = vpow2.f32 %v3320_v28 }
 0x1fc   :  { %v733_v35 = vadd.f32 1.0, %v4167_v33  ;;  %v4169_v36 = vpop.eup %4168 }
 0x1fd   :  { %v759_v3 = vadd.f32 1.0, %v4169_v36  ;;  %v4781_v36 = vld [vmem:[%s5393_s1 + $0x94] ss:$12 sps:$4 sm:$0xff]  }
 0x1fe   :  { %4182 = vrcp.f32 %v733_v35 }
 0x1ff   :  { %v4171_v37 = vpop.eup %4170 }
 0x200   :  { %v4173_v40 = vpop.eup %4172  ;;  %v734_v43 = vadd.f32 1.0, %v4171_v37  ;;  %v4786_v37 = vld [vmem:[%s5393_s1 + $0x90] ss:$12 sps:$4 sm:$0xff]  }
 0x201   :  { %v760_v7 = vadd.f32 1.0, %v4173_v40  ;;  %v4801_v40 = vld [vmem:[%s5393_s1 + $0x78] ss:$12 sps:$4 sm:$0xff]  }
 0x202   :  { %4184 = vrcp.f32 %v734_v43  ;;  %v4808_v43 = vld [vmem:[%s5393_s1 + $0x64] ss:$12 sps:$4 sm:$0xff]  }
 0x203   :  { %v4175_v6 = vpop.eup %4174  ;;  %4186 = vrcp.f32 %v759_v3  ;;  %v4047_v3 = vld [vmem:[%s5393_s1 + $0x98] ss:$12 sps:$4 sm:$0xff]  }
 0x204   :  { %v775_v11 = vmul.f32 %v4175_v6, %v771_v5  ;;  %v4177_v14 = vpop.eup %4176  ;;  %4188 = vrcp.f32 %v760_v7  ;;  %v4823_v5 = vld [vmem:[%s5393_s1 + $0x4c] ss:$12 sps:$4 sm:$0xff]   ;;  %v4831_v7 = vld [vmem:[%s5393_s1 + $0x48] ss:$12 sps:$4 sm:$0xff]  }
 0x205   :  { %v761_v46 = vadd.f32 1.0, %v4177_v14  ;;  %v4051_v6 = vld [vmem:[%s5393_s1 + $0x80] ss:$12 sps:$4 sm:$0xff]   ;;  %v4852_v14 = vld [vmem:[%s5393_s1 + $0x1c] ss:$12 sps:$4 sm:$0xff]  }
 0x206   :  { %v779_v15 = vadd.f32 %v775_v11, %v705_v4  ;;  %v4816_v4 = vld [vmem:[%s5393_s1 + $0x60] ss:$12 sps:$4 sm:$0xff]   ;;  %v4846_v11 = vld [vmem:[%s5393_s1 + $0x30] ss:$12 sps:$4 sm:$0xff]  }
 0x207   :  { %v4179_v20 = vpop.eup %4178 }
 0x208   :  { %v4181_v21 = vpop.eup %4180  ;;  %4190 = vtanh.f32 %v779_v15  ;;  %v776_v23 = vmul.f32 %v4179_v20, %v772_v18  ;;  %v4059_v15 = vld [vmem:[%s5393_s1 + $0x50] ss:$12 sps:$4 sm:$0xff]   ;;  %v4063_v20 = vld [vmem:[%s5393_s1 + $0x38] ss:$12 sps:$4 sm:$0xff]  }
 0x209   :  { %v762_v49 = vadd.f32 1.0, %v4181_v21  ;;  %v4867_v18 = vld [vmem:[%s5393_s1 + $0x4] ss:$12 sps:$4 sm:$0xff]   ;;  %v4876_v21 = vld [vmem:[%s5393_s1] ss:$12 sps:$4 sm:$0xff]  }
 0x20a   :  { %v780_v47 = vadd.f32 %v776_v23, %v708_v16  ;;  %v4861_v16 = vld [vmem:[%s5393_s1 + $0x18] ss:$12 sps:$4 sm:$0xff]   ;;  %v4064_v23 = vld [vmem:[%s5393_s1 + $0x20] ss:$12 sps:$4 sm:$0xff]  }
 0x20b   :  { %v4183_v48 = vpop.eup %4182 }
 0x20c   :  { %v777_v50 = vmul.f32 %v4183_v48, %v773_v45  ;;  %4192 = vtanh.f32 %v780_v47  ;;  %v3353_v45 = vld [vmem:[%s5394_s0 + $0x60] sm:$0xff]  ;;  %v3355_v47 = vld [vmem:[%s5394_s0 + $0x6c] sm:$0xff] }
 0x20d   :  { %4194 = vrcp.f32 %v761_v46  ;;  %v1105_v46 = vunpack.c.l.bf16 %v3353_v45 }
 0x20e   :  { %v781_v51 = vadd.f32 %v777_v50, %v711_v44  ;;  %4196 = vrcp.f32 %v762_v49  ;;  %v4065_v44 = vld [vmem:[%s5393_s1 + $0x8] ss:$12 sps:$4 sm:$0xff]   ;;  %v1108_v50 = vunpack.c.l.bf16 %v3355_v47 }
 0x20f   :  { %v4185_v54 = vpop.eup %4184 }
 0x210   :  { %4198 = vtanh.f32 %v781_v51  ;;  %v778_v55 = vmul.f32 %v4185_v54, %v774_v53  ;;  %v4187_v57 = vpop.eup %4186  ;;  %v1106_v54 = vunpack.c.h.bf16 %v3353_v45 }
 0x211   :  { %v4189_v58 = vpop.eup %4188  ;;  %v787_v60 = vsub.f32 1.0, %v4187_v57  ;;  %v795_v2 = vmul.f32 %v4187_v57, %v4661_v29 }
 0x212   :  { %v782_v56 = vadd.f32 %v778_v55, %v714_v52  ;;  %v788_v61 = vsub.f32 1.0, %v4189_v58  ;;  %v796_v9 = vmul.f32 %v4189_v58, %v4663_v30  ;;  %v3357_v52 = vld [vmem:[%s5394_s0 + $0x78] sm:$0xff] }
 0x213   :  { %v1111_v57 = vunpack.c.l.bf16 %v3357_v52 }
 0x214   :  { %4200 = vtanh.f32 %v782_v56 }
 0x215   :  { %v4191_v59 = vpop.eup %4190 }
 0x216   :  { %v791_v62 = vmul.f32 %v4191_v59, %v787_v60  ;;  %v1109_v59 = vunpack.c.h.bf16 %v3355_v47  ;;  %v3359_v60 = vld [vmem:[%s5394_s0 + $0x84] sm:$0xff] }
 0x218   :  { %v4744_v17 = vadd.f32 %v795_v2, %v791_v62  ;;  %v1114_v2 = vunpack.c.l.bf16 %v3359_v60 }
 0x219   :  { %v4193_v63 = vpop.eup %4192 }
 0x21a   :  { %v792_v0 = vmul.f32 %v4193_v63, %v788_v61  ;;  %v4195_v12 = vpop.eup %4194 }
 0x21b   :  { %v4197_v13 = vpop.eup %4196  ;;  %v789_v25 = vsub.f32 1.0, %v4195_v12  ;;  %v797_v28 = vmul.f32 %v4195_v12, %v4673_v41  ;;  %v4769_v41 = vld [vmem:[%s5393_s1 + $0xac] ss:$12 sps:$4 sm:$0xff]  }
 0x21c   :  { %v4746_v19 = vadd.f32 %v796_v9, %v792_v0  ;;  %v790_v29 = vsub.f32 1.0, %v4197_v13  ;;  %v798_v31 = vmul.f32 %v4197_v13, %v4675_v42  ;;  %v4774_v42 = vld [vmem:[%s5393_s1 + $0xa8] ss:$12 sps:$4 sm:$0xff]   ;;  %1396 = vmatprep.subr.bf16.mxu0 %v4769_v41 }
 0x21d   :  { %v4199_v22 = vpop.eup %4198 }
 0x21e   :  { %v3662_v24 = vpack.c.bf16 %v4746_v19, %v4744_v17  ;;  %v793_v26 = vmul.f32 %v4199_v22, %v789_v25 }
 0x220   :  { %3730 = vst [vmem:[%s5396_s3 + $0x10] sm:$0xff] %v3662_v24   ;;  %1027 = vmatmul.mubr.bf16.vlgmr.msra.gmra.mxu0 %v3662_v24  ;;  %3880 = vmatprep.mubr.bf16.mxu1 %v3662_v24  ;;  %v4756_v33 = vadd.f32 %v797_v28, %v793_v26  ;;  %v1112_v24 = vunpack.c.h.bf16 %v3357_v52 }
 0x221   :  { %v4201_v30 = vpop.eup %4200  ;;  %1036 = vmatprep.mubr.bf16.mxu0 %v4444_v1  ;;  %1397 = vmatpush1.bf16.msra.mxu0 %v4774_v42 }
 0x222   :  { %v794_v27 = vmul.f32 %v4201_v30, %v790_v29  ;;  %1398 = vmatprep.subr.bf16.mxu0 %v4781_v36  ;;  %v1115_v30 = vunpack.c.h.bf16 %v3359_v60 }
 0x224   :  { %v4758_v34 = vadd.f32 %v798_v31, %v794_v27 }
 0x225   :  { %1399 = vmatpush1.bf16.msra.mxu0 %v4786_v37 }
 0x226   :  { %v3667_v35 = vpack.c.bf16 %v4758_v34, %v4756_v33  ;;  %1400 = vmatprep.subr.bf16.mxu0 %v4793_v38 }
 0x228   :  { %3731 = vst [vmem:[%s5396_s3 + $0x18] sm:$0xff] %v3667_v35   ;;  %1037 = vmatmul.mubr.bf16.gmra.mxu0 %v3667_v35  ;;  %3881 = vmatmul.mubr.bf16.vlgmr.msra.gmra.mxu1 %v3667_v35 }
 0x229   :  { %1428 = vmatprep.mubr.bf16.mxu0 %v4444_v1  ;;  %1401 = vmatpush1.bf16.msra.mxu0 %v4801_v40 }
 0x22a   :  { %3885 = vmatpush3.bf16.msra.mxu1 %v4043_v39  ;;  %1402 = vmatprep.subr.bf16.mxu0 %v4808_v43 }
 0x22b   :  { %3886 = vmatprep.subr.bf16.mxu1 %v4047_v3 }
 0x22d   :  { %1403 = vmatpush1.bf16.msra.mxu0 %v4816_v4 }
 0x22e   :  { %3887 = vmatpush3.bf16.msra.mxu1 %v4047_v3  ;;  %1404 = vmatprep.subr.bf16.mxu0 %v4823_v5 }
 0x22f   :  { %3888 = vmatprep.subr.bf16.mxu1 %v4051_v6 }
 0x231   :  { %1405 = vmatpush1.bf16.msra.mxu0 %v4831_v7 }
 0x232   :  { %3889 = vmatpush3.bf16.msra.mxu1 %v4051_v6  ;;  %1406 = vmatprep.subr.bf16.mxu0 %v4838_v8 }
 0x233   :  { %3890 = vmatprep.subr.bf16.mxu1 %v4055_v10 }
 0x235   :  { %1407 = vmatpush1.bf16.msra.mxu0 %v4846_v11 }
 0x236   :  { %3891 = vmatpush3.bf16.msra.mxu1 %v4055_v10  ;;  %1408 = vmatprep.subr.bf16.mxu0 %v4852_v14 }
 0x237   :  { %3892 = vmatprep.subr.bf16.mxu1 %v4059_v15 }
 0x239   :  { %1409 = vmatpush1.bf16.msra.mxu0 %v4861_v16 }
 0x23a   :  { %3893 = vmatpush3.bf16.msra.mxu1 %v4059_v15  ;;  %1410 = vmatprep.subr.bf16.mxu0 %v4867_v18 }
 0x23b   :  { %3894 = vmatprep.subr.bf16.mxu1 %v4063_v20 }
 0x23d   :  { %1411 = vmatpush1.bf16.msra.mxu0 %v4876_v21 }
 0x23e   :  { %3895 = vmatpush3.bf16.msra.mxu1 %v4063_v20  ;;  %1798 = vmatprep.subr.bf16.mxu0 %v4769_v41 }
 0x23f   :  { %3896 = vmatprep.subr.bf16.mxu1 %v4064_v23 }
 0x242   :  { %3897 = vmatpush3.bf16.msra.mxu1 %v4064_v23 }
 0x243   :  { %3898 = vmatprep.subr.bf16.mxu1 %v4065_v44 }
 0x246   :  { %3899 = vmatpush3.bf16.msra.mxu1 %v4065_v44 }
 0x2e0   :  { %v1028_v48 = vpop.f32.mrf.mxu0 }
 0x2e1   :  { %v1117_v49 = vadd.f32 %v1105_v46, %v1028_v48 }
 0x2e2   :  { %v1030_v51 = vpop.f32.mrf.mxu0 }
 0x2e3   :  { %v3361_v53 = vmul.f32 -1.442695, %v1117_v49  ;;  %v1145_v62 = vadd.f32 %v1106_v54, %v1030_v51  ;;  %v3358_v49 = vld [vmem:[%s5394_s0 + $0x68] ss:$24 sps:$4 sm:$0xff]  }
 0x2e4   :  { %v1032_v55 = vpop.f32.mrf.mxu0  ;;  %v1107_v54 = vunpack.c.l.bf16 %v3358_v49 }
 0x2e5   :  { %4202 = vpow2.f32 %v3361_v53  ;;  %v1118_v56 = vadd.f32 %v1108_v50, %v1032_v55  ;;  %v3365_v22 = vmul.f32 -1.442695, %v1145_v62 }
 0x2e6   :  { %v1034_v58 = vpop.f32.mrf.mxu0 }
 0x2e7   :  { %v3362_v61 = vmul.f32 -1.442695, %v1118_v56  ;;  %v1146_v9 = vadd.f32 %v1109_v59, %v1034_v58  ;;  %v3360_v58 = vld [vmem:[%s5394_s0 + $0x74] ss:$24 sps:$4 sm:$0xff]  }
 0x2e8   :  { %v1038_v63 = vpop.f32.mrf.mxu0  ;;  %v3882_v15 = vpop.f32.mrf.mxu1 }
 0x2e9   :  { %4204 = vpow2.f32 %v3362_v61  ;;  %v1119_v0 = vadd.f32 %v1111_v57, %v1038_v63  ;;  %v3366_v26 = vmul.f32 -1.442695, %v1146_v9  ;;  %v1110_v63 = vunpack.c.l.bf16 %v3360_v58 }
 0x2ea   :  { %v1040_v12 = vpop.f32.mrf.mxu0  ;;  %v1081_v45 = vpop.f32.mrf.mxu1 }
 0x2eb   :  { %v3363_v13 = vmul.f32 -1.442695, %v1119_v0  ;;  %v1147_v31 = vadd.f32 %v1112_v24, %v1040_v12  ;;  %v1173_v55 = vadd.f32 %v4649_v32, %v1081_v45 }
 0x2ec   :  { %v1042_v25 = vpop.f32.mrf.mxu0  ;;  %v3883_v50 = vpop.f32.mrf.mxu1 }
 0x2ed   :  { %4206 = vpow2.f32 %v3363_v13  ;;  %v1120_v29 = vadd.f32 %v1114_v2, %v1042_v25  ;;  %v3367_v6 = vmul.f32 -1.442695, %v1147_v31  ;;  %v1113_v13 = vunpack.c.h.bf16 %v3358_v49 }
 0x2ee   :  { %v1044_v28 = vpop.f32.mrf.mxu0  ;;  %4208 = vpow2.f32 %v3365_v22  ;;  %v1084_v59 = vpop.f32.mrf.mxu1  ;;  %v1175_v22 = vadd.f32 %v3882_v15, %v4649_v32  ;;  %v1176_v31 = vadd.f32 %v3883_v50, %v4649_v32 }
 0x2ef   :  { %v3364_v27 = vmul.f32 -1.442695, %v1120_v29  ;;  %v1148_v39 = vadd.f32 %v1115_v30, %v1044_v28  ;;  %v1174_v0 = vadd.f32 %v4649_v32, %v1084_v59  ;;  %v1116_v28 = vunpack.c.h.bf16 %v3360_v58 }
 0x2f1   :  { %4210 = vpow2.f32 %v3364_v27  ;;  %v3368_v20 = vmul.f32 -1.442695, %v1148_v39 }
 0x2f2   :  { %v4203_v35 = vpop.eup %4202  ;;  %4212 = vpow2.f32 %v3366_v26 }
 0x2f3   :  { %v1133_v3 = vadd.f32 1.0, %v4203_v35 }
 0x2f5   :  { %4214 = vrcp.f32 %v1133_v3 }
 0x2f6   :  { %v4205_v10 = vpop.eup %4204  ;;  %4216 = vpow2.f32 %v3367_v6 }
 0x2f7   :  { %v1134_v23 = vadd.f32 1.0, %v4205_v10 }
 0x2f9   :  { %4218 = vrcp.f32 %v1134_v23 }
 0x2fa   :  { %v4207_v44 = vpop.eup %4206  ;;  %4220 = vpow2.f32 %v3368_v20 }
 0x2fb   :  { %v1135_v46 = vadd.f32 1.0, %v4207_v44  ;;  %v4209_v47 = vpop.eup %4208 }
 0x2fc   :  { %v1161_v53 = vadd.f32 1.0, %v4209_v47 }
 0x2fd   :  { %4222 = vrcp.f32 %v1135_v46 }
 0x2fe   :  { %v4211_v48 = vpop.eup %4210 }
 0x2ff   :  { %v4213_v51 = vpop.eup %4212  ;;  %v1136_v52 = vadd.f32 1.0, %v4211_v48 }
 0x300   :  { %v1162_v57 = vadd.f32 1.0, %v4213_v51 }
 0x301   :  { %4224 = vrcp.f32 %v1136_v52 }
 0x302   :  { %v4215_v56 = vpop.eup %4214  ;;  %4226 = vrcp.f32 %v1161_v53 }
 0x303   :  { %v1177_v60 = vmul.f32 %v4215_v56, %v1173_v55  ;;  %v4217_v61 = vpop.eup %4216  ;;  %4228 = vrcp.f32 %v1162_v57 }
 0x304   :  { %v1163_v24 = vadd.f32 1.0, %v4217_v61 }
 0x305   :  { %v1181_v62 = vadd.f32 %v1177_v60, %v1107_v54 }
 0x306   :  { %v4219_v2 = vpop.eup %4218 }
 0x307   :  { %v4221_v9 = vpop.eup %4220  ;;  %4230 = vtanh.f32 %v1181_v62  ;;  %v1178_v12 = vmul.f32 %v4219_v2, %v1174_v0  ;;  %v4068_v62 = vld [vmem:[%s5393_s1 + $0x80] ss:$12 sps:$4 sm:$0xff]   ;;  %v4071_v0 = vld [vmem:[%s5393_s1 + $0x38] ss:$12 sps:$4 sm:$0xff]  }
 0x308   :  { %v1164_v26 = vadd.f32 1.0, %v4221_v9  ;;  %v4072_v2 = vld [vmem:[%s5393_s1 + $0x20] ss:$12 sps:$4 sm:$0xff]   ;;  %v4073_v9 = vld [vmem:[%s5393_s1 + $0x8] ss:$12 sps:$4 sm:$0xff]  }
 0x309   :  { %v1182_v25 = vadd.f32 %v1178_v12, %v1110_v63  ;;  %v4070_v63 = vld [vmem:[%s5393_s1 + $0x50] ss:$12 sps:$4 sm:$0xff]  }
 0x30a   :  { %v4223_v29 = vpop.eup %4222  ;;  %v3401_v12 = vld [vmem:[%s5394_s0 + $0x90] sm:$0xff] }
 0x30b   :  { %v1179_v30 = vmul.f32 %v4223_v29, %v1175_v22  ;;  %4232 = vtanh.f32 %v1182_v25  ;;  %v3403_v22 = vld [vmem:[%s5394_s0 + $0x9c] sm:$0xff] }
 0x30c   :  { %4234 = vrcp.f32 %v1163_v24  ;;  %v1510_v29 = vunpack.c.l.bf16 %v3403_v22 }
 0x30d   :  { %v1183_v27 = vadd.f32 %v1179_v30, %v1113_v13  ;;  %4236 = vrcp.f32 %v1164_v26  ;;  %v1507_v13 = vunpack.c.l.bf16 %v3401_v12  ;;  %v3405_v30 = vld [vmem:[%s5394_s0 + $0xa8] sm:$0xff] }
 0x30e   :  { %v4225_v35 = vpop.eup %4224 }
 0x30f   :  { %4238 = vtanh.f32 %v1183_v27  ;;  %v1180_v39 = vmul.f32 %v4225_v35, %v1176_v31  ;;  %v4227_v6 = vpop.eup %4226 }
 0x310   :  { %v4229_v10 = vpop.eup %4228  ;;  %v1189_v20 = vsub.f32 1.0, %v4227_v6  ;;  %v1197_v47 = vmul.f32 %v4227_v6, %v4744_v17  ;;  %v1511_v6 = vunpack.c.h.bf16 %v3403_v22  ;;  %v3406_v22 = vld [vmem:[%s5394_s0 + $0x98] ss:$24 sps:$4 sm:$0xff]  }
 0x311   :  { %v1184_v3 = vadd.f32 %v1180_v39, %v1116_v28  ;;  %v1190_v23 = vsub.f32 1.0, %v4229_v10  ;;  %v1198_v48 = vmul.f32 %v4229_v10, %v4746_v19  ;;  %v1508_v28 = vunpack.c.h.bf16 %v3401_v12  ;;  %v3407_v10 = vld [vmem:[%s5394_s0 + $0xb4] sm:$0xff] }
 0x312   :  { %v1513_v39 = vunpack.c.l.bf16 %v3405_v30 }
 0x313   :  { %4240 = vtanh.f32 %v1184_v3 }
 0x314   :  { %v4231_v15 = vpop.eup %4230 }
 0x315   :  { %v1193_v44 = vmul.f32 %v4231_v15, %v1189_v20 }
 0x317   :  { %v4911_v50 = vadd.f32 %v1197_v47, %v1193_v44 }
 0x318   :  { %v4233_v45 = vpop.eup %4232 }
 0x319   :  { %v1194_v46 = vmul.f32 %v4233_v45, %v1190_v23  ;;  %v4235_v49 = vpop.eup %4234  ;;  %v1516_v45 = vunpack.c.l.bf16 %v3407_v10 }
 0x31a   :  { %v4237_v32 = vpop.eup %4236  ;;  %v1191_v54 = vsub.f32 1.0, %v4235_v49  ;;  %v1199_v57 = vmul.f32 %v4235_v49, %v4756_v33  ;;  %v4066_v33 = vld [vmem:[%s5393_s1 + $0xb0] ss:$12 sps:$4 sm:$0xff]  }
 0x31b   :  { %v4913_v51 = vadd.f32 %v1198_v48, %v1194_v46  ;;  %v1192_v17 = vsub.f32 1.0, %v4237_v32  ;;  %v1200_v58 = vmul.f32 %v4237_v32, %v4758_v34  ;;  %3904 = vmatprep.subr.bf16.mxu1 %v4066_v33  ;;  %v4067_v34 = vld [vmem:[%s5393_s1 + $0x98] ss:$12 sps:$4 sm:$0xff]   ;;  %v1514_v32 = vunpack.c.h.bf16 %v3405_v30 }
 0x31c   :  { %v4239_v52 = vpop.eup %4238  ;;  %v1509_v30 = vunpack.c.l.bf16 %v3406_v22 }
 0x31d   :  { %v3672_v53 = vpack.c.bf16 %v4913_v51, %v4911_v50  ;;  %v1195_v55 = vmul.f32 %v4239_v52, %v1191_v54 }
 0x31f   :  { %3732 = vst [vmem:[%s5396_s3 + $0x20] sm:$0xff] %v3672_v53   ;;  %1429 = vmatmul.mubr.bf16.vlgmr.msra.gmra.mxu0 %v3672_v53  ;;  %3900 = vmatprep.mubr.bf16.mxu1 %v3672_v53  ;;  %v4925_v59 = vadd.f32 %v1199_v57, %v1195_v55 }
 0x320   :  { %v4241_v19 = vpop.eup %4240  ;;  %1438 = vmatprep.mubr.bf16.mxu0 %v4444_v1  ;;  %1799 = vmatpush1.bf16.msra.mxu0 %v4774_v42 }
 0x321   :  { %v1196_v56 = vmul.f32 %v4241_v19, %v1192_v17  ;;  %1800 = vmatprep.subr.bf16.mxu0 %v4781_v36  ;;  %v1517_v17 = vunpack.c.h.bf16 %v3407_v10 }
 0x323   :  { %v4927_v60 = vadd.f32 %v1200_v58, %v1196_v56 }
 0x324   :  { %1801 = vmatpush1.bf16.msra.mxu0 %v4786_v37 }
 0x325   :  { %v3677_v61 = vpack.c.bf16 %v4927_v60, %v4925_v59  ;;  %1802 = vmatprep.subr.bf16.mxu0 %v4793_v38 }
 0x327   :  { %3733 = vst [vmem:[%s5396_s3 + $0x28] sm:$0xff] %v3677_v61   ;;  %1439 = vmatmul.mubr.bf16.gmra.mxu0 %v3677_v61  ;;  %3901 = vmatmul.mubr.bf16.vlgmr.msra.gmra.mxu1 %v3677_v61 }
 0x328   :  { %1803 = vmatpush1.bf16.msra.mxu0 %v4801_v40  ;;  %1830 = vmatprep.mubr.bf16.mxu0 %v4444_v1 }
 0x329   :  { %1804 = vmatprep.subr.bf16.mxu0 %v4808_v43  ;;  %3905 = vmatpush3.bf16.msra.mxu1 %v4066_v33 }
 0x32a   :  { %3906 = vmatprep.subr.bf16.mxu1 %v4067_v34 }
 0x32c   :  { %1805 = vmatpush1.bf16.msra.mxu0 %v4816_v4 }
 0x32d   :  { %1806 = vmatprep.subr.bf16.mxu0 %v4823_v5  ;;  %3907 = vmatpush3.bf16.msra.mxu1 %v4067_v34 }
 0x32e   :  { %3908 = vmatprep.subr.bf16.mxu1 %v4068_v62 }
 0x330   :  { %1807 = vmatpush1.bf16.msra.mxu0 %v4831_v7 }
 0x331   :  { %1808 = vmatprep.subr.bf16.mxu0 %v4838_v8  ;;  %3909 = vmatpush3.bf16.msra.mxu1 %v4068_v62 }
 0x334   :  { %1809 = vmatpush1.bf16.msra.mxu0 %v4846_v11 }
 0x335   :  { %1810 = vmatprep.subr.bf16.mxu0 %v4852_v14 }
 0x338   :  { %1811 = vmatpush1.bf16.msra.mxu0 %v4861_v16 }
 0x339   :  { %1812 = vmatprep.subr.bf16.mxu0 %v4867_v18 }
 0x33c   :  { %1813 = vmatpush1.bf16.msra.mxu0 %v4876_v21 }
 0x33d   :  { %2200 = vmatprep.subr.bf16.mxu0 %v4769_v41  ;;  %v4069_v41 = vld [vmem:[%s5393_s1 + $0x68] ss:$12 sps:$4 sm:$0xff]  }
 0x33e   :  { %3910 = vmatprep.subr.bf16.mxu1 %v4069_v41 }
 0x33f   :  { %3911 = vmatpush3.bf16.msra.mxu1 %v4069_v41 }
 0x340   :  { %3912 = vmatprep.subr.bf16.mxu1 %v4070_v63 }
 0x343   :  { %3913 = vmatpush3.bf16.msra.mxu1 %v4070_v63 }
 0x344   :  { %3914 = vmatprep.subr.bf16.mxu1 %v4071_v0 }
 0x347   :  { %3915 = vmatpush3.bf16.msra.mxu1 %v4071_v0 }
 0x348   :  { %3916 = vmatprep.subr.bf16.mxu1 %v4072_v2 }
 0x34b   :  { %3917 = vmatpush3.bf16.msra.mxu1 %v4072_v2 }
 0x34c   :  { %3918 = vmatprep.subr.bf16.mxu1 %v4073_v9 }
 0x34f   :  { %3919 = vmatpush3.bf16.msra.mxu1 %v4073_v9 }
 0x3df   :  { %v1430_v24 = vpop.f32.mrf.mxu0 }
 0x3e0   :  { %v1519_v25 = vadd.f32 %v1507_v13, %v1430_v24 }
 0x3e1   :  { %v1432_v26 = vpop.f32.mrf.mxu0 }
 0x3e2   :  { %v3409_v27 = vmul.f32 -1.442695, %v1519_v25  ;;  %v1547_v20 = vadd.f32 %v1508_v28, %v1432_v26 }
 0x3e3   :  { %v1434_v31 = vpop.f32.mrf.mxu0 }
 0x3e4   :  { %4242 = vpow2.f32 %v3409_v27  ;;  %v1520_v35 = vadd.f32 %v1510_v29, %v1434_v31  ;;  %v3413_v49 = vmul.f32 -1.442695, %v1547_v20  ;;  %v4991_v27 = vld [vmem:[%s5395_s2] ss:$0 sm:$0xff] }
 0x3e5   :  { %v1436_v3 = vpop.f32.mrf.mxu0 }
 0x3e6   :  { %v3410_v15 = vmul.f32 -1.442695, %v1520_v35  ;;  %v1548_v46 = vadd.f32 %v1511_v6, %v1436_v3 }
 0x3e7   :  { %v1440_v23 = vpop.f32.mrf.mxu0  ;;  %v3902_v62 = vpop.f32.mrf.mxu1 }
 0x3e8   :  { %4244 = vpow2.f32 %v3410_v15  ;;  %v1521_v44 = vadd.f32 %v1513_v39, %v1440_v23  ;;  %v3414_v54 = vmul.f32 -1.442695, %v1548_v46  ;;  %v3408_v39 = vld [vmem:[%s5394_s0 + $0xa4] ss:$24 sps:$4 sm:$0xff]  }
 0x3e9   :  { %v1442_v47 = vpop.f32.mrf.mxu0  ;;  %v1483_v2 = vpop.f32.mrf.mxu1  ;;  %v1512_v20 = vunpack.c.l.bf16 %v3408_v39 }
 0x3ea   :  { %v3411_v48 = vmul.f32 -1.442695, %v1521_v44  ;;  %v1549_v56 = vadd.f32 %v1514_v32, %v1442_v47  ;;  %v1575_v28 = vadd.f32 %v4991_v27, %v1483_v2  ;;  %v1515_v47 = vunpack.c.h.bf16 %v3406_v22 }
 0x3eb   :  { %v1444_v52 = vpop.f32.mrf.mxu0  ;;  %v3903_v24 = vpop.f32.mrf.mxu1 }
 0x3ec   :  { %4246 = vpow2.f32 %v3411_v48  ;;  %v1522_v53 = vadd.f32 %v1516_v45, %v1444_v52  ;;  %v3415_v33 = vmul.f32 -1.442695, %v1549_v56  ;;  %v1577_v48 = vadd.f32 %v4991_v27, %v3902_v62 }
 0x3ed   :  { %v1446_v19 = vpop.f32.mrf.mxu0  ;;  %4248 = vpow2.f32 %v3413_v49  ;;  %v1486_v3 = vpop.f32.mrf.mxu1 }
 0x3ee   :  { %v3412_v55 = vmul.f32 -1.442695, %v1522_v53  ;;  %v1550_v58 = vadd.f32 %v1517_v17, %v1446_v19  ;;  %v1576_v23 = vadd.f32 %v4991_v27, %v1486_v3  ;;  %v1578_v19 = vadd.f32 %v4991_v27, %v3903_v24 }
 0x3f0   :  { %4250 = vpow2.f32 %v3412_v55  ;;  %v3416_v41 = vmul.f32 -1.442695, %v1550_v58  ;;  %v1518_v55 = vunpack.c.h.bf16 %v3408_v39 }
 0x3f1   :  { %v4243_v57 = vpop.eup %4242  ;;  %4252 = vpow2.f32 %v3414_v54 }
 0x3f2   :  { %v1535_v61 = vadd.f32 1.0, %v4243_v57 }
 0x3f4   :  { %4254 = vrcp.f32 %v1535_v61 }
 0x3f5   :  { %v4245_v34 = vpop.eup %4244  ;;  %4256 = vpow2.f32 %v3415_v33 }
 0x3f6   :  { %v1536_v63 = vadd.f32 1.0, %v4245_v34 }
 0x3f8   :  { %4258 = vrcp.f32 %v1536_v63 }
 0x3f9   :  { %v4247_v0 = vpop.eup %4246  ;;  %4260 = vpow2.f32 %v3416_v41 }
 0x3fa   :  { %v1537_v9 = vadd.f32 1.0, %v4247_v0  ;;  %v4249_v12 = vpop.eup %4248 }
 0x3fb   :  { %v1563_v26 = vadd.f32 1.0, %v4249_v12 }
 0x3fc   :  { %4262 = vrcp.f32 %v1537_v9 }
 0x3fd   :  { %v4251_v13 = vpop.eup %4250 }
 0x3fe   :  { %v4253_v25 = vpop.eup %4252  ;;  %v1538_v29 = vadd.f32 1.0, %v4251_v13 }
 0x3ff   :  { %v1564_v35 = vadd.f32 1.0, %v4253_v25 }
 0x400   :  { %4264 = vrcp.f32 %v1538_v29 }
 0x401   :  { %v4255_v31 = vpop.eup %4254  ;;  %4266 = vrcp.f32 %v1563_v26 }
 0x402   :  { %v1579_v6 = vmul.f32 %v4255_v31, %v1575_v28  ;;  %v4257_v10 = vpop.eup %4256  ;;  %4268 = vrcp.f32 %v1564_v35 }
 0x403   :  { %v1565_v49 = vadd.f32 1.0, %v4257_v10 }
 0x404   :  { %v1583_v15 = vadd.f32 %v1579_v6, %v1509_v30 }
 0x405   :  { %v4259_v44 = vpop.eup %4258 }
 0x406   :  { %v4261_v45 = vpop.eup %4260  ;;  %4270 = vtanh.f32 %v1583_v15  ;;  %v1580_v46 = vmul.f32 %v4259_v44, %v1576_v23 }
 0x407   :  { %v1566_v53 = vadd.f32 1.0, %v4261_v45 }
 0x408   :  { %v1584_v32 = vadd.f32 %v1580_v46, %v1512_v20 }
 0x409   :  { %v4263_v52 = vpop.eup %4262 }
 0x40a   :  { %v1581_v54 = vmul.f32 %v4263_v52, %v1577_v48  ;;  %4272 = vtanh.f32 %v1584_v32 }
 0x40b   :  { %4274 = vrcp.f32 %v1565_v49 }
 0x40c   :  { %v1585_v17 = vadd.f32 %v1581_v54, %v1515_v47  ;;  %4276 = vrcp.f32 %v1566_v53  ;;  %v3455_v47 = vld [vmem:[%s5394_s0 + $0xe4] sm:$0xff] }
 0x40d   :  { %v4265_v56 = vpop.eup %4264  ;;  %v1918_v53 = vunpack.c.l.bf16 %v3455_v47 }
 0x40e   :  { %4278 = vtanh.f32 %v1585_v17  ;;  %v1582_v57 = vmul.f32 %v4265_v56, %v1578_v19  ;;  %v4267_v61 = vpop.eup %4266 }
 0x40f   :  { %v4269_v33 = vpop.eup %4268  ;;  %v1591_v62 = vsub.f32 1.0, %v4267_v61  ;;  %v1599_v9 = vmul.f32 %v4267_v61, %v4911_v50 }
 0x410   :  { %v1586_v58 = vadd.f32 %v1582_v57, %v1518_v55  ;;  %v1592_v41 = vsub.f32 1.0, %v4269_v33  ;;  %v1600_v12 = vmul.f32 %v4269_v33, %v4913_v51  ;;  %v1919_v33 = vunpack.c.h.bf16 %v3455_v47 }
 0x412   :  { %4280 = vtanh.f32 %v1586_v58 }
 0x413   :  { %v4271_v34 = vpop.eup %4270 }
 0x414   :  { %v1595_v63 = vmul.f32 %v4271_v34, %v1591_v62 }
 0x416   :  { %v5002_v24 = vadd.f32 %v1599_v9, %v1595_v63 }
 0x417   :  { %v4273_v0 = vpop.eup %4272 }
 0x418   :  { %v1596_v2 = vmul.f32 %v4273_v0, %v1592_v41  ;;  %v4275_v13 = vpop.eup %4274 }
 0x419   :  { %v4277_v22 = vpop.eup %4276  ;;  %v1593_v30 = vsub.f32 1.0, %v4275_v13  ;;  %v1601_v35 = vmul.f32 %v4275_v13, %v4925_v59  ;;  %v3453_v59 = vld [vmem:[%s5394_s0 + $0xd8] sm:$0xff] }
 0x41a   :  { %v5004_v25 = vadd.f32 %v1600_v12, %v1596_v2  ;;  %v1594_v50 = vsub.f32 1.0, %v4277_v22  ;;  %v1602_v39 = vmul.f32 %v4277_v22, %v4927_v60  ;;  %v1915_v44 = vunpack.c.l.bf16 %v3453_v59 }
 0x41b   :  { %v4279_v29 = vpop.eup %4278  ;;  %v1916_v56 = vunpack.c.h.bf16 %v3453_v59 }
 0x41c   :  { %v3682_v26 = vpack.c.bf16 %v5004_v25, %v5002_v24  ;;  %v1597_v28 = vmul.f32 %v4279_v29, %v1593_v30 }
 0x41e   :  { %3734 = vst [vmem:[%s5396_s3 + $0x30] sm:$0xff] %v3682_v26   ;;  %1831 = vmatmul.mubr.bf16.vlgmr.msra.gmra.mxu0 %v3682_v26  ;;  %3920 = vmatprep.mubr.bf16.mxu1 %v3682_v26  ;;  %v5016_v3 = vadd.f32 %v1601_v35, %v1597_v28 }
 0x41f   :  { %v4281_v51 = vpop.eup %4280  ;;  %1840 = vmatprep.mubr.bf16.mxu0 %v4444_v1  ;;  %2201 = vmatpush1.bf16.msra.mxu0 %v4774_v42  ;;  %v4074_v42 = vld [vmem:[%s5393_s1 + $0xb0] ss:$12 sps:$4 sm:$0xff]  }
 0x420   :  { %v1598_v31 = vmul.f32 %v4281_v51, %v1594_v50  ;;  %2202 = vmatprep.subr.bf16.mxu0 %v4781_v36  ;;  %3924 = vmatprep.subr.bf16.mxu1 %v4074_v42  ;;  %v4075_v36 = vld [vmem:[%s5393_s1 + $0x98] ss:$12 sps:$4 sm:$0xff]  }
 0x422   :  { %v5018_v6 = vadd.f32 %v1602_v39, %v1598_v31  ;;  %v3454_v31 = vld [vmem:[%s5394_s0 + $0xc8] ss:$24 sps:$4 sm:$0xff]  }
 0x423   :  { %2203 = vmatpush1.bf16.msra.mxu0 %v4786_v37  ;;  %v4076_v37 = vld [vmem:[%s5393_s1 + $0x80] ss:$12 sps:$4 sm:$0xff]   ;;  %v1917_v59 = vunpack.c.h.bf16 %v3454_v31 }
 0x424   :  { %v3687_v10 = vpack.c.bf16 %v5018_v6, %v5016_v3  ;;  %2204 = vmatprep.subr.bf16.mxu0 %v4793_v38  ;;  %v4077_v38 = vld [vmem:[%s5393_s1 + $0x68] ss:$12 sps:$4 sm:$0xff]  }
 0x426   :  { %3735 = vst [vmem:[%s5396_s3 + $0x38] sm:$0xff] %v3687_v10   ;;  %1841 = vmatmul.mubr.bf16.gmra.mxu0 %v3687_v10  ;;  %3921 = vmatmul.mubr.bf16.vlgmr.msra.gmra.mxu1 %v3687_v10 }
 0x427   :  { %2205 = vmatpush1.bf16.msra.mxu0 %v4801_v40  ;;  %2232 = vmatprep.mubr.bf16.mxu0 %v4444_v1  ;;  %v4078_v40 = vld [vmem:[%s5393_s1 + $0x50] ss:$12 sps:$4 sm:$0xff]  }
 0x428   :  { %2206 = vmatprep.subr.bf16.mxu0 %v4808_v43  ;;  %3925 = vmatpush3.bf16.msra.mxu1 %v4074_v42  ;;  %v4079_v43 = vld [vmem:[%s5393_s1 + $0x38] ss:$12 sps:$4 sm:$0xff]  }
 0x429   :  { %3926 = vmatprep.subr.bf16.mxu1 %v4075_v36 }
 0x42b   :  { %2207 = vmatpush1.bf16.msra.mxu0 %v4816_v4  ;;  %v4080_v4 = vld [vmem:[%s5393_s1 + $0x20] ss:$12 sps:$4 sm:$0xff]  }
 0x42c   :  { %2208 = vmatprep.subr.bf16.mxu0 %v4823_v5  ;;  %3927 = vmatpush3.bf16.msra.mxu1 %v4075_v36  ;;  %v4081_v5 = vld [vmem:[%s5393_s1 + $0x8] ss:$12 sps:$4 sm:$0xff]   ;;  %v1911_v36 = vunpack.c.l.bf16 %v3454_v31 }
 0x42d   :  { %3928 = vmatprep.subr.bf16.mxu1 %v4076_v37  ;;  %v5133_v31 = vld [vmem:[%s5393_s1 + $0x7c] ss:$12 sps:$4 sm:$0xff]  }
 0x42f   :  { %2209 = vmatpush1.bf16.msra.mxu0 %v4831_v7  ;;  %v3449_v7 = vld [vmem:[%s5394_s0 + $0xc0] sm:$0xff] }
 0x430   :  { %2210 = vmatprep.subr.bf16.mxu0 %v4838_v8  ;;  %3929 = vmatpush3.bf16.msra.mxu1 %v4076_v37  ;;  %v1909_v8 = vunpack.c.l.bf16 %v3449_v7  ;;  %v1910_v15 = vunpack.c.h.bf16 %v3449_v7 }
 0x431   :  { %3930 = vmatprep.subr.bf16.mxu1 %v4077_v38 }
 0x433   :  { %2211 = vmatpush1.bf16.msra.mxu0 %v4846_v11  ;;  %v3451_v11 = vld [vmem:[%s5394_s0 + $0xcc] sm:$0xff] }
 0x434   :  { %2212 = vmatprep.subr.bf16.mxu0 %v4852_v14  ;;  %3931 = vmatpush3.bf16.msra.mxu1 %v4077_v38  ;;  %v1913_v46 = vunpack.c.h.bf16 %v3451_v11 }
 0x435   :  { %3932 = vmatprep.subr.bf16.mxu1 %v4078_v40 }
 0x437   :  { %2213 = vmatpush1.bf16.msra.mxu0 %v4861_v16 }
 0x438   :  { %2214 = vmatprep.subr.bf16.mxu0 %v4867_v18  ;;  %3933 = vmatpush3.bf16.msra.mxu1 %v4078_v40  ;;  %v1912_v18 = vunpack.c.l.bf16 %v3451_v11 }
 0x439   :  { %3934 = vmatprep.subr.bf16.mxu1 %v4079_v43 }
 0x43b   :  { %2215 = vmatpush1.bf16.msra.mxu0 %v4876_v21 }
 0x43c   :  { %3935 = vmatpush3.bf16.msra.mxu1 %v4079_v43  ;;  %v3456_v43 = vld [vmem:[%s5394_s0 + $0xd4] ss:$24 sps:$4 sm:$0xff]  }
 0x43d   :  { %3936 = vmatprep.subr.bf16.mxu1 %v4080_v4  ;;  %v1914_v11 = vunpack.c.l.bf16 %v3456_v43  ;;  %v1920_v47 = vunpack.c.h.bf16 %v3456_v43  ;;  %v5178_v43 = vld [vmem:[%s5393_s1 + $0x34] ss:$12 sps:$4 sm:$0xff]  }
 0x440   :  { %3937 = vmatpush3.bf16.msra.mxu1 %v4080_v4 }
 0x441   :  { %3938 = vmatprep.subr.bf16.mxu1 %v4081_v5 }
 0x444   :  { %3939 = vmatpush3.bf16.msra.mxu1 %v4081_v5 }
 0x4de   :  { %v1832_v14 = vpop.f32.mrf.mxu0 }
 0x4df   :  { %v1921_v16 = vadd.f32 %v1909_v8, %v1832_v14 }
 0x4e0   :  { %v1834_v21 = vpop.f32.mrf.mxu0 }
 0x4e1   :  { %v3457_v60 = vmul.f32 -1.442695, %v1921_v16  ;;  %v1949_v49 = vadd.f32 %v1910_v15, %v1834_v21 }
 0x4e2   :  { %v1836_v20 = vpop.f32.mrf.mxu0 }
 0x4e3   :  { %4282 = vpow2.f32 %v3457_v60  ;;  %v1922_v23 = vadd.f32 %v1912_v18, %v1836_v20  ;;  %v3461_v19 = vmul.f32 -1.442695, %v1949_v49 }
 0x4e4   :  { %v1838_v45 = vpop.f32.mrf.mxu0 }
 0x4e5   :  { %v3458_v48 = vmul.f32 -1.442695, %v1922_v23  ;;  %v1950_v54 = vadd.f32 %v1913_v46, %v1838_v45 }
 0x4e6   :  { %v1842_v32 = vpop.f32.mrf.mxu0  ;;  %v3922_v13 = vpop.f32.mrf.mxu1 }
 0x4e7   :  { %4284 = vpow2.f32 %v3458_v48  ;;  %v1923_v52 = vadd.f32 %v1915_v44, %v1842_v32  ;;  %v3462_v61 = vmul.f32 -1.442695, %v1950_v54  ;;  %v1979_v60 = vadd.f32 %v4991_v27, %v3922_v13 }
 0x4e8   :  { %v1844_v17 = vpop.f32.mrf.mxu0  ;;  %v1885_v30 = vpop.f32.mrf.mxu1 }
 0x4e9   :  { %v3459_v55 = vmul.f32 -1.442695, %v1923_v52  ;;  %v1951_v41 = vadd.f32 %v1916_v56, %v1844_v17  ;;  %v1977_v37 = vadd.f32 %v4991_v27, %v1885_v30 }
 0x4ea   :  { %v1846_v57 = vpop.f32.mrf.mxu0  ;;  %v3923_v35 = vpop.f32.mrf.mxu1 }
 0x4eb   :  { %4286 = vpow2.f32 %v3459_v55  ;;  %v1924_v58 = vadd.f32 %v1918_v53, %v1846_v57  ;;  %v3463_v9 = vmul.f32 -1.442695, %v1951_v41  ;;  %v1980_v48 = vadd.f32 %v4991_v27, %v3923_v35  ;;  %v4091_v35 = vld [vmem:[%s5393_s1 + $0xb0] ss:$12 sps:$4 sm:$0xff]  }
 0x4ec   :  { %v1848_v62 = vpop.f32.mrf.mxu0  ;;  %4288 = vpow2.f32 %v3461_v19  ;;  %v1888_v4 = vpop.f32.mrf.mxu1  ;;  %3944 = vmatprep.subr.bf16.mxu1 %v4091_v35 }
 0x4ed   :  { %v3460_v34 = vmul.f32 -1.442695, %v1924_v58  ;;  %v1952_v0 = vadd.f32 %v1919_v33, %v1848_v62  ;;  %v1978_v14 = vadd.f32 %v4991_v27, %v1888_v4  ;;  %v4103_v4 = vld [vmem:[%s5393_s1 + $0x68] ss:$12 sps:$4 sm:$0xff]  }
 0x4ef   :  { %4290 = vpow2.f32 %v3460_v34  ;;  %v3464_v22 = vmul.f32 -1.442695, %v1952_v0 }
 0x4f0   :  { %v4283_v63 = vpop.eup %4282  ;;  %4292 = vpow2.f32 %v3462_v61 }
 0x4f1   :  { %v1937_v2 = vadd.f32 1.0, %v4283_v63 }
 0x4f3   :  { %4294 = vrcp.f32 %v1937_v2 }
 0x4f4   :  { %v4285_v12 = vpop.eup %4284  ;;  %4296 = vpow2.f32 %v3463_v9 }
 0x4f5   :  { %v1938_v29 = vadd.f32 1.0, %v4285_v12 }
 0x4f7   :  { %4298 = vrcp.f32 %v1938_v29 }
 0x4f8   :  { %v4287_v26 = vpop.eup %4286  ;;  %4300 = vpow2.f32 %v3464_v22 }
 0x4f9   :  { %v1939_v50 = vadd.f32 1.0, %v4287_v26  ;;  %v4289_v28 = vpop.eup %4288 }
 0x4fa   :  { %v1965_v42 = vadd.f32 1.0, %v4289_v28  ;;  %v5121_v28 = vld [vmem:[%s5393_s1 + $0x94] ss:$12 sps:$4 sm:$0xff]  }
 0x4fb   :  { %4302 = vrcp.f32 %v1939_v50 }
 0x4fc   :  { %v4291_v51 = vpop.eup %4290 }
 0x4fd   :  { %v4293_v39 = vpop.eup %4292  ;;  %v1940_v10 = vadd.f32 1.0, %v4291_v51  ;;  %v5126_v51 = vld [vmem:[%s5393_s1 + $0x90] ss:$12 sps:$4 sm:$0xff]  }
 0x4fe   :  { %v1966_v40 = vadd.f32 1.0, %v4293_v39  ;;  %v5141_v39 = vld [vmem:[%s5393_s1 + $0x78] ss:$12 sps:$4 sm:$0xff]  }
 0x4ff   :  { %4304 = vrcp.f32 %v1940_v10  ;;  %v5148_v10 = vld [vmem:[%s5393_s1 + $0x64] ss:$12 sps:$4 sm:$0xff]  }
 0x500   :  { %v4295_v38 = vpop.eup %4294  ;;  %4306 = vrcp.f32 %v1965_v42  ;;  %v4095_v42 = vld [vmem:[%s5393_s1 + $0x98] ss:$12 sps:$4 sm:$0xff]  }
 0x501   :  { %v1981_v5 = vmul.f32 %v4295_v38, %v1977_v37  ;;  %v4297_v7 = vpop.eup %4296  ;;  %4308 = vrcp.f32 %v1966_v40  ;;  %v5163_v37 = vld [vmem:[%s5393_s1 + $0x4c] ss:$12 sps:$4 sm:$0xff]   ;;  %v5171_v40 = vld [vmem:[%s5393_s1 + $0x48] ss:$12 sps:$4 sm:$0xff]  }
 0x502   :  { %v1967_v15 = vadd.f32 1.0, %v4297_v7  ;;  %v4099_v38 = vld [vmem:[%s5393_s1 + $0x80] ss:$12 sps:$4 sm:$0xff]   ;;  %v5192_v7 = vld [vmem:[%s5393_s1 + $0x1c] ss:$12 sps:$4 sm:$0xff]  }
 0x503   :  { %v1985_v8 = vadd.f32 %v1981_v5, %v1911_v36  ;;  %v5156_v36 = vld [vmem:[%s5393_s1 + $0x60] ss:$12 sps:$4 sm:$0xff]   ;;  %v5186_v5 = vld [vmem:[%s5393_s1 + $0x30] ss:$12 sps:$4 sm:$0xff]  }
 0x504   :  { %v4299_v16 = vpop.eup %4298 }
 0x505   :  { %v4301_v18 = vpop.eup %4300  ;;  %4310 = vtanh.f32 %v1985_v8  ;;  %v1982_v21 = vmul.f32 %v4299_v16, %v1978_v14  ;;  %v4107_v8 = vld [vmem:[%s5393_s1 + $0x50] ss:$12 sps:$4 sm:$0xff]   ;;  %v4111_v16 = vld [vmem:[%s5393_s1 + $0x38] ss:$12 sps:$4 sm:$0xff]  }
 0x506   :  { %v1968_v44 = vadd.f32 1.0, %v4301_v18  ;;  %v5207_v14 = vld [vmem:[%s5393_s1 + $0x4] ss:$12 sps:$4 sm:$0xff]   ;;  %v5216_v18 = vld [vmem:[%s5393_s1] ss:$12 sps:$4 sm:$0xff]  }
 0x507   :  { %v1986_v20 = vadd.f32 %v1982_v21, %v1914_v11  ;;  %v5201_v11 = vld [vmem:[%s5393_s1 + $0x18] ss:$12 sps:$4 sm:$0xff]   ;;  %v4112_v21 = vld [vmem:[%s5393_s1 + $0x20] ss:$12 sps:$4 sm:$0xff]  }
 0x508   :  { %v4303_v23 = vpop.eup %4302 }
 0x509   :  { %v1983_v45 = vmul.f32 %v4303_v23, %v1979_v60  ;;  %4312 = vtanh.f32 %v1986_v20  ;;  %v3497_v60 = vld [vmem:[%s5394_s0 + $0xf0] sm:$0xff]  ;;  %v3499_v20 = vld [vmem:[%s5394_s0 + $0xfc] sm:$0xff] }
 0x50a   :  { %4314 = vrcp.f32 %v1967_v15  ;;  %v2311_v15 = vunpack.c.l.bf16 %v3497_v60 }
 0x50b   :  { %v1987_v46 = vadd.f32 %v1983_v45, %v1917_v59  ;;  %4316 = vrcp.f32 %v1968_v44  ;;  %v4113_v59 = vld [vmem:[%s5393_s1 + $0x8] ss:$12 sps:$4 sm:$0xff]   ;;  %v2314_v45 = vunpack.c.l.bf16 %v3499_v20 }
 0x50c   :  { %v4305_v49 = vpop.eup %4304 }
 0x50d   :  { %4318 = vtanh.f32 %v1987_v46  ;;  %v1984_v32 = vmul.f32 %v4305_v49, %v1980_v48  ;;  %v4307_v53 = vpop.eup %4306  ;;  %v2312_v49 = vunpack.c.h.bf16 %v3497_v60 }
 0x50e   :  { %v4309_v54 = vpop.eup %4308  ;;  %v1993_v55 = vsub.f32 1.0, %v4307_v53  ;;  %v2001_v61 = vmul.f32 %v4307_v53, %v5002_v24 }
 0x50f   :  { %v1988_v52 = vadd.f32 %v1984_v32, %v1920_v47  ;;  %v1994_v19 = vsub.f32 1.0, %v4309_v54  ;;  %v2002_v33 = vmul.f32 %v4309_v54, %v5004_v25  ;;  %v3501_v47 = vld [vmem:[%s5394_s0 + $0x108] sm:$0xff] }
 0x510   :  { %v2317_v53 = vunpack.c.l.bf16 %v3501_v47 }
 0x511   :  { %4320 = vtanh.f32 %v1988_v52 }
 0x512   :  { %v4311_v17 = vpop.eup %4310 }
 0x513   :  { %v1997_v56 = vmul.f32 %v4311_v17, %v1993_v55  ;;  %v2315_v17 = vunpack.c.h.bf16 %v3499_v20  ;;  %v3503_v55 = vld [vmem:[%s5394_s0 + $0x114] sm:$0xff] }
 0x515   :  { %v5087_v41 = vadd.f32 %v2001_v61, %v1997_v56  ;;  %v2320_v61 = vunpack.c.l.bf16 %v3503_v55 }
 0x516   :  { %v4313_v57 = vpop.eup %4312 }
 0x517   :  { %v1998_v58 = vmul.f32 %v4313_v57, %v1994_v19  ;;  %v4315_v34 = vpop.eup %4314 }
 0x518   :  { %v4317_v62 = vpop.eup %4316  ;;  %v1995_v9 = vsub.f32 1.0, %v4315_v34  ;;  %v2003_v22 = vmul.f32 %v4315_v34, %v5016_v3  ;;  %v4084_v3 = vld [vmem:[%s5393_s1 + $0xac] ss:$12 sps:$4 sm:$0xff]  }
 0x519   :  { %v5089_v63 = vadd.f32 %v2002_v33, %v1998_v58  ;;  %v1996_v24 = vsub.f32 1.0, %v4317_v62  ;;  %v2004_v29 = vmul.f32 %v4317_v62, %v5018_v6  ;;  %v5115_v6 = vld [vmem:[%s5393_s1 + $0xa8] ss:$12 sps:$4 sm:$0xff]   ;;  %2602 = vmatprep.subr.bf16.mxu0 %v4084_v3 }
 0x51a   :  { %v4319_v0 = vpop.eup %4318 }
 0x51b   :  { %v3692_v2 = vpack.c.bf16 %v5089_v63, %v5087_v41  ;;  %v1999_v12 = vmul.f32 %v4319_v0, %v1995_v9 }
 0x51d   :  { %3736 = vst [vmem:[%s5396_s3 + $0x40] sm:$0xff] %v3692_v2   ;;  %2233 = vmatmul.mubr.bf16.vlgmr.msra.gmra.mxu0 %v3692_v2  ;;  %3940 = vmatprep.mubr.bf16.mxu1 %v3692_v2  ;;  %v5099_v26 = vadd.f32 %v2003_v22, %v1999_v12  ;;  %v2318_v2 = vunpack.c.h.bf16 %v3501_v47 }
 0x51e   :  { %v4321_v25 = vpop.eup %4320  ;;  %2242 = vmatprep.mubr.bf16.mxu0 %v4444_v1  ;;  %2603 = vmatpush1.bf16.msra.mxu0 %v5115_v6 }
 0x51f   :  { %v2000_v13 = vmul.f32 %v4321_v25, %v1996_v24  ;;  %2604 = vmatprep.subr.bf16.mxu0 %v5121_v28  ;;  %v2321_v25 = vunpack.c.h.bf16 %v3503_v55 }
 0x521   :  { %v5101_v30 = vadd.f32 %v2004_v29, %v2000_v13 }
 0x522   :  { %2605 = vmatpush1.bf16.msra.mxu0 %v5126_v51 }
 0x523   :  { %v3697_v50 = vpack.c.bf16 %v5101_v30, %v5099_v26  ;;  %2606 = vmatprep.subr.bf16.mxu0 %v5133_v31 }
 0x525   :  { %3737 = vst [vmem:[%s5396_s3 + $0x48] sm:$0xff] %v3697_v50   ;;  %2243 = vmatmul.mubr.bf16.gmra.mxu0 %v3697_v50  ;;  %3941 = vmatmul.mubr.bf16.vlgmr.msra.gmra.mxu1 %v3697_v50 }
 0x526   :  { %2634 = vmatprep.mubr.bf16.mxu0 %v4444_v1  ;;  %2607 = vmatpush1.bf16.msra.mxu0 %v5141_v39 }
 0x527   :  { %3945 = vmatpush3.bf16.msra.mxu1 %v4091_v35  ;;  %2608 = vmatprep.subr.bf16.mxu0 %v5148_v10 }
 0x528   :  { %3946 = vmatprep.subr.bf16.mxu1 %v4095_v42 }
 0x52a   :  { %2609 = vmatpush1.bf16.msra.mxu0 %v5156_v36 }
 0x52b   :  { %3947 = vmatpush3.bf16.msra.mxu1 %v4095_v42  ;;  %2610 = vmatprep.subr.bf16.mxu0 %v5163_v37 }
 0x52c   :  { %3948 = vmatprep.subr.bf16.mxu1 %v4099_v38 }
 0x52e   :  { %2611 = vmatpush1.bf16.msra.mxu0 %v5171_v40 }
 0x52f   :  { %3949 = vmatpush3.bf16.msra.mxu1 %v4099_v38  ;;  %2612 = vmatprep.subr.bf16.mxu0 %v5178_v43 }
 0x530   :  { %3950 = vmatprep.subr.bf16.mxu1 %v4103_v4 }
 0x532   :  { %2613 = vmatpush1.bf16.msra.mxu0 %v5186_v5 }
 0x533   :  { %3951 = vmatpush3.bf16.msra.mxu1 %v4103_v4  ;;  %2614 = vmatprep.subr.bf16.mxu0 %v5192_v7 }
 0x534   :  { %3952 = vmatprep.subr.bf16.mxu1 %v4107_v8 }
 0x536   :  { %2615 = vmatpush1.bf16.msra.mxu0 %v5201_v11 }
 0x537   :  { %3953 = vmatpush3.bf16.msra.mxu1 %v4107_v8  ;;  %2616 = vmatprep.subr.bf16.mxu0 %v5207_v14 }
 0x538   :  { %3954 = vmatprep.subr.bf16.mxu1 %v4111_v16 }
 0x53a   :  { %2617 = vmatpush1.bf16.msra.mxu0 %v5216_v18 }
 0x53b   :  { %3955 = vmatpush3.bf16.msra.mxu1 %v4111_v16  ;;  %3004 = vmatprep.subr.bf16.mxu0 %v4084_v3 }
 0x53c   :  { %3956 = vmatprep.subr.bf16.mxu1 %v4112_v21 }
 0x53f   :  { %3957 = vmatpush3.bf16.msra.mxu1 %v4112_v21 }
 0x540   :  { %3958 = vmatprep.subr.bf16.mxu1 %v4113_v59 }
 0x543   :  { %3959 = vmatpush3.bf16.msra.mxu1 %v4113_v59 }
 0x5dd   :  { %v2234_v23 = vpop.f32.mrf.mxu0 }
 0x5de   :  { %v2323_v44 = vadd.f32 %v2311_v15, %v2234_v23  ;;  %v3502_v23 = vld [vmem:[%s5394_s0 + $0xf8] ss:$24 sps:$4 sm:$0xff]  }
 0x5df   :  { %v2236_v46 = vpop.f32.mrf.mxu0 }
 0x5e0   :  { %v3505_v48 = vmul.f32 -1.442695, %v2323_v44  ;;  %v2351_v56 = vadd.f32 %v2312_v49, %v2236_v46 }
 0x5e1   :  { %v2238_v32 = vpop.f32.mrf.mxu0 }
 0x5e2   :  { %4322 = vpow2.f32 %v3505_v48  ;;  %v2324_v52 = vadd.f32 %v2314_v45, %v2238_v32  ;;  %v3509_v0 = vmul.f32 -1.442695, %v2351_v56  ;;  %v2313_v48 = vunpack.c.l.bf16 %v3502_v23 }
 0x5e3   :  { %v2240_v54 = vpop.f32.mrf.mxu0 }
 0x5e4   :  { %v3506_v19 = vmul.f32 -1.442695, %v2324_v52  ;;  %v2352_v33 = vadd.f32 %v2315_v17, %v2240_v54 }
 0x5e5   :  { %v2244_v57 = vpop.f32.mrf.mxu0  ;;  %v3942_v4 = vpop.f32.mrf.mxu1 }
 0x5e6   :  { %4324 = vpow2.f32 %v3506_v19  ;;  %v2325_v58 = vadd.f32 %v2317_v53, %v2244_v57  ;;  %v3510_v12 = vmul.f32 -1.442695, %v2352_v33  ;;  %v3504_v53 = vld [vmem:[%s5394_s0 + $0x104] ss:$24 sps:$4 sm:$0xff]  }
 0x5e7   :  { %v2246_v34 = vpop.f32.mrf.mxu0  ;;  %v2287_v59 = vpop.f32.mrf.mxu1  ;;  %v2316_v56 = vunpack.c.l.bf16 %v3504_v53 }
 0x5e8   :  { %v3507_v62 = vmul.f32 -1.442695, %v2325_v58  ;;  %v2353_v29 = vadd.f32 %v2318_v2, %v2246_v34  ;;  %v2379_v49 = vadd.f32 %v4991_v27, %v2287_v59  ;;  %v2319_v34 = vunpack.c.h.bf16 %v3502_v23 }
 0x5e9   :  { %v2248_v9 = vpop.f32.mrf.mxu0  ;;  %v3943_v44 = vpop.f32.mrf.mxu1 }
 0x5ea   :  { %4326 = vpow2.f32 %v3507_v62  ;;  %v2326_v24 = vadd.f32 %v2320_v61, %v2248_v9  ;;  %v3511_v42 = vmul.f32 -1.442695, %v2353_v29  ;;  %v2381_v62 = vadd.f32 %v4991_v27, %v3942_v4 }
 0x5eb   :  { %v2250_v22 = vpop.f32.mrf.mxu0  ;;  %4328 = vpow2.f32 %v3509_v0  ;;  %v2290_v54 = vpop.f32.mrf.mxu1 }
 0x5ec   :  { %v3508_v13 = vmul.f32 -1.442695, %v2326_v24  ;;  %v2354_v3 = vadd.f32 %v2321_v25, %v2250_v22  ;;  %v2380_v57 = vadd.f32 %v4991_v27, %v2290_v54  ;;  %v2382_v22 = vadd.f32 %v4991_v27, %v3943_v44 }
 0x5ee   :  { %4330 = vpow2.f32 %v3508_v13  ;;  %v3512_v8 = vmul.f32 -1.442695, %v2354_v3  ;;  %v2322_v13 = vunpack.c.h.bf16 %v3504_v53 }
 0x5ef   :  { %v4323_v50 = vpop.eup %4322  ;;  %4332 = vpow2.f32 %v3510_v12 }
 0x5f0   :  { %v2339_v35 = vadd.f32 1.0, %v4323_v50 }
 0x5f2   :  { %4334 = vrcp.f32 %v2339_v35 }
 0x5f3   :  { %v4325_v38 = vpop.eup %4324  ;;  %4336 = vpow2.f32 %v3511_v42 }
 0x5f4   :  { %v2340_v16 = vadd.f32 1.0, %v4325_v38 }
 0x5f6   :  { %4338 = vrcp.f32 %v2340_v16 }
 0x5f7   :  { %v4327_v21 = vpop.eup %4326  ;;  %4340 = vpow2.f32 %v3512_v8 }
 0x5f8   :  { %v2341_v60 = vadd.f32 1.0, %v4327_v21  ;;  %v4329_v15 = vpop.eup %4328 }
 0x5f9   :  { %v2367_v47 = vadd.f32 1.0, %v4329_v15 }
 0x5fa   :  { %4342 = vrcp.f32 %v2341_v60 }
 0x5fb   :  { %v4331_v20 = vpop.eup %4330 }
 0x5fc   :  { %v4333_v45 = vpop.eup %4332  ;;  %v2342_v46 = vadd.f32 1.0, %v4331_v20 }
 0x5fd   :  { %v2368_v52 = vadd.f32 1.0, %v4333_v45 }
 0x5fe   :  { %4344 = vrcp.f32 %v2342_v46 }
 0x5ff   :  { %v4335_v32 = vpop.eup %4334  ;;  %4346 = vrcp.f32 %v2367_v47 }
 0x600   :  { %v2383_v17 = vmul.f32 %v4335_v32, %v2379_v49  ;;  %v4337_v55 = vpop.eup %4336  ;;  %4348 = vrcp.f32 %v2368_v52 }
 0x601   :  { %v2369_v0 = vadd.f32 1.0, %v4337_v55 }
 0x602   :  { %v2387_v19 = vadd.f32 %v2383_v17, %v2313_v48 }
 0x603   :  { %v4339_v58 = vpop.eup %4338 }
 0x604   :  { %v4341_v61 = vpop.eup %4340  ;;  %4350 = vtanh.f32 %v2387_v19  ;;  %v2384_v33 = vmul.f32 %v4339_v58, %v2380_v57 }
 0x605   :  { %v2370_v24 = vadd.f32 1.0, %v4341_v61 }
 0x606   :  { %v2388_v2 = vadd.f32 %v2384_v33, %v2316_v56  ;;  %v3551_v33 = vld [vmem:[%s5394_s0 + $0x144] sm:$0xff] }
 0x607   :  { %v4343_v9 = vpop.eup %4342 }
 0x608   :  { %v2385_v12 = vmul.f32 %v4343_v9, %v2381_v62  ;;  %4352 = vtanh.f32 %v2388_v2  ;;  %v2722_v9 = vunpack.c.l.bf16 %v3551_v33 }
 0x609   :  { %4354 = vrcp.f32 %v2369_v0 }
 0x60a   :  { %v2389_v25 = vadd.f32 %v2385_v12, %v2319_v34  ;;  %4356 = vrcp.f32 %v2370_v24 }
 0x60b   :  { %v4345_v29 = vpop.eup %4344 }
 0x60c   :  { %4358 = vtanh.f32 %v2389_v25  ;;  %v2386_v50 = vmul.f32 %v4345_v29, %v2382_v22  ;;  %v4347_v35 = vpop.eup %4346 }
 0x60d   :  { %v4349_v42 = vpop.eup %4348  ;;  %v2395_v4 = vsub.f32 1.0, %v4347_v35  ;;  %v2403_v60 = vmul.f32 %v4347_v35, %v5087_v41  ;;  %v2723_v35 = vunpack.c.h.bf16 %v3551_v33 }
 0x60e   :  { %v2390_v3 = vadd.f32 %v2386_v50, %v2322_v13  ;;  %v2396_v8 = vsub.f32 1.0, %v4349_v42  ;;  %v2404_v15 = vmul.f32 %v4349_v42, %v5089_v63 }
 0x610   :  { %4360 = vtanh.f32 %v2390_v3 }
 0x611   :  { %v4351_v38 = vpop.eup %4350 }
 0x612   :  { %v2399_v16 = vmul.f32 %v4351_v38, %v2395_v4 }
 0x614   :  { %v5250_v23 = vadd.f32 %v2403_v60, %v2399_v16 }
 0x615   :  { %v4353_v21 = vpop.eup %4352 }
 0x616   :  { %v2400_v59 = vmul.f32 %v4353_v21, %v2396_v8  ;;  %v4355_v20 = vpop.eup %4354 }
 0x617   :  { %v4357_v27 = vpop.eup %4356  ;;  %v2397_v47 = vsub.f32 1.0, %v4355_v20  ;;  %v2405_v32 = vmul.f32 %v4355_v20, %v5099_v26  ;;  %v4114_v26 = vld [vmem:[%s5393_s1 + $0xb0] ss:$12 sps:$4 sm:$0xff]  }
 0x618   :  { %v5252_v44 = vadd.f32 %v2404_v15, %v2400_v59  ;;  %v2398_v41 = vsub.f32 1.0, %v4357_v27  ;;  %v2406_v52 = vmul.f32 %v4357_v27, %v5101_v30  ;;  %3964 = vmatprep.subr.bf16.mxu1 %v4114_v26  ;;  %v4115_v30 = vld [vmem:[%s5393_s1 + $0x98] ss:$12 sps:$4 sm:$0xff]  }
 0x619   :  { %v4359_v45 = vpop.eup %4358 }
 0x61a   :  { %v3702_v46 = vpack.c.bf16 %v5252_v44, %v5250_v23  ;;  %v2401_v48 = vmul.f32 %v4359_v45, %v2397_v47 }
 0x61c   :  { %3738 = vst [vmem:[%s5396_s3 + $0x50] sm:$0xff] %v3702_v46   ;;  %2635 = vmatmul.mubr.bf16.vlgmr.msra.gmra.mxu0 %v3702_v46  ;;  %3960 = vmatprep.mubr.bf16.mxu1 %v3702_v46  ;;  %v5264_v53 = vadd.f32 %v2405_v32, %v2401_v48 }
 0x61d   :  { %v4361_v63 = vpop.eup %4360  ;;  %2644 = vmatprep.mubr.bf16.mxu0 %v4444_v1  ;;  %3005 = vmatpush1.bf16.msra.mxu0 %v5115_v6  ;;  %v4116_v6 = vld [vmem:[%s5393_s1 + $0x80] ss:$12 sps:$4 sm:$0xff]  }
 0x61e   :  { %v2402_v49 = vmul.f32 %v4361_v63, %v2398_v41  ;;  %3006 = vmatprep.subr.bf16.mxu0 %v5121_v28  ;;  %v4117_v28 = vld [vmem:[%s5393_s1 + $0x68] ss:$12 sps:$4 sm:$0xff]  }
 0x61f   :  { %v3550_v63 = vld [vmem:[%s5394_s0 + $0x128] ss:$24 sps:$4 sm:$0xff]  }
 0x620   :  { %v5266_v54 = vadd.f32 %v2406_v52, %v2402_v49 }
 0x621   :  { %3007 = vmatpush1.bf16.msra.mxu0 %v5126_v51  ;;  %v4118_v51 = vld [vmem:[%s5393_s1 + $0x50] ss:$12 sps:$4 sm:$0xff]  }
 0x622   :  { %v3707_v17 = vpack.c.bf16 %v5266_v54, %v5264_v53  ;;  %3008 = vmatprep.subr.bf16.mxu0 %v5133_v31  ;;  %v4119_v31 = vld [vmem:[%s5393_s1 + $0x38] ss:$12 sps:$4 sm:$0xff]  }
 0x624   :  { %3739 = vst [vmem:[%s5396_s3 + $0x58] sm:$0xff] %v3707_v17   ;;  %2645 = vmatmul.mubr.bf16.gmra.mxu0 %v3707_v17  ;;  %3961 = vmatmul.mubr.bf16.vlgmr.msra.gmra.mxu1 %v3707_v17 }
 0x625   :  { %3009 = vmatpush1.bf16.msra.mxu0 %v5141_v39  ;;  %3036 = vmatprep.mubr.bf16.mxu0 %v4444_v1  ;;  %v4120_v39 = vld [vmem:[%s5393_s1 + $0x20] ss:$12 sps:$4 sm:$0xff]  }
 0x626   :  { %3010 = vmatprep.subr.bf16.mxu0 %v5148_v10  ;;  %3965 = vmatpush3.bf16.msra.mxu1 %v4114_v26  ;;  %v4121_v10 = vld [vmem:[%s5393_s1 + $0x8] ss:$12 sps:$4 sm:$0xff]   ;;  %v2715_v26 = vunpack.c.l.bf16 %v3550_v63 }
 0x627   :  { %3966 = vmatprep.subr.bf16.mxu1 %v4115_v30 }
 0x629   :  { %3011 = vmatpush1.bf16.msra.mxu0 %v5156_v36  ;;  %v3545_v36 = vld [vmem:[%s5394_s0 + $0x120] sm:$0xff] }
 0x62a   :  { %3012 = vmatprep.subr.bf16.mxu0 %v5163_v37  ;;  %3967 = vmatpush3.bf16.msra.mxu1 %v4115_v30  ;;  %v2713_v37 = vunpack.c.l.bf16 %v3545_v36  ;;  %v2714_v55 = vunpack.c.h.bf16 %v3545_v36  ;;  %v5329_v30 = vld [vmem:[%s5395_s2] ss:$0 sm:$0xff] }
 0x62b   :  { %3968 = vmatprep.subr.bf16.mxu1 %v4116_v6 }
 0x62d   :  { %3013 = vmatpush1.bf16.msra.mxu0 %v5171_v40  ;;  %v3547_v40 = vld [vmem:[%s5394_s0 + $0x12c] sm:$0xff] }
 0x62e   :  { %3014 = vmatprep.subr.bf16.mxu0 %v5178_v43  ;;  %3969 = vmatpush3.bf16.msra.mxu1 %v4116_v6  ;;  %v2717_v61 = vunpack.c.h.bf16 %v3547_v40 }
 0x62f   :  { %3970 = vmatprep.subr.bf16.mxu1 %v4117_v28 }
 0x631   :  { %3015 = vmatpush1.bf16.msra.mxu0 %v5186_v5 }
 0x632   :  { %3016 = vmatprep.subr.bf16.mxu0 %v5192_v7  ;;  %3971 = vmatpush3.bf16.msra.mxu1 %v4117_v28  ;;  %v2716_v7 = vunpack.c.l.bf16 %v3547_v40 }
 0x633   :  { %3972 = vmatprep.subr.bf16.mxu1 %v4118_v51 }
 0x635   :  { %3017 = vmatpush1.bf16.msra.mxu0 %v5201_v11 }
 0x636   :  { %3018 = vmatprep.subr.bf16.mxu0 %v5207_v14  ;;  %3973 = vmatpush3.bf16.msra.mxu1 %v4118_v51  ;;  %v3549_v14 = vld [vmem:[%s5394_s0 + $0x138] sm:$0xff] }
 0x637   :  { %3974 = vmatprep.subr.bf16.mxu1 %v4119_v31  ;;  %v2719_v57 = vunpack.c.l.bf16 %v3549_v14  ;;  %v2720_v22 = vunpack.c.h.bf16 %v3549_v14  ;;  %v2721_v14 = vunpack.c.h.bf16 %v3550_v63 }
 0x639   :  { %3019 = vmatpush1.bf16.msra.mxu0 %v5216_v18 }
 0x63a   :  { %3975 = vmatpush3.bf16.msra.mxu1 %v4119_v31  ;;  %v3552_v31 = vld [vmem:[%s5394_s0 + $0x134] ss:$24 sps:$4 sm:$0xff]  }
 0x63b   :  { %3976 = vmatprep.subr.bf16.mxu1 %v4120_v39  ;;  %v2718_v40 = vunpack.c.l.bf16 %v3552_v31  ;;  %v2724_v33 = vunpack.c.h.bf16 %v3552_v31 }
 0x63e   :  { %3977 = vmatpush3.bf16.msra.mxu1 %v4120_v39 }
 0x63f   :  { %3978 = vmatprep.subr.bf16.mxu1 %v4121_v10 }
 0x642   :  { %3979 = vmatpush3.bf16.msra.mxu1 %v4121_v10 }
 0x6dc   :  { %v2636_v43 = vpop.f32.mrf.mxu0 }
 0x6dd   :  { %v2725_v5 = vadd.f32 %v2713_v37, %v2636_v43 }
 0x6de   :  { %v2638_v11 = vpop.f32.mrf.mxu0 }
 0x6df   :  { %v3553_v18 = vmul.f32 -1.442695, %v2725_v5  ;;  %v2753_v62 = vadd.f32 %v2714_v55, %v2638_v11 }
 0x6e0   :  { %v2640_v19 = vpop.f32.mrf.mxu0 }
 0x6e1   :  { %4362 = vpow2.f32 %v3553_v18  ;;  %v2726_v56 = vadd.f32 %v2716_v7, %v2640_v19  ;;  %v3557_v13 = vmul.f32 -1.442695, %v2753_v62 }
 0x6e2   :  { %v2642_v58 = vpop.f32.mrf.mxu0 }
 0x6e3   :  { %v3554_v34 = vmul.f32 -1.442695, %v2726_v56  ;;  %v2754_v24 = vadd.f32 %v2717_v61, %v2642_v58 }
 0x6e4   :  { %v2646_v0 = vpop.f32.mrf.mxu0  ;;  %v3962_v15 = vpop.f32.mrf.mxu1 }
 0x6e5   :  { %4364 = vpow2.f32 %v3554_v34  ;;  %v2727_v2 = vadd.f32 %v2719_v57, %v2646_v0  ;;  %v3558_v3 = vmul.f32 -1.442695, %v2754_v24  ;;  %v2783_v18 = vadd.f32 %v5329_v30, %v3962_v15 }
 0x6e6   :  { %v2648_v12 = vpop.f32.mrf.mxu0  ;;  %v2689_v46 = vpop.f32.mrf.mxu1 }
 0x6e7   :  { %v3555_v25 = vmul.f32 -1.442695, %v2727_v2  ;;  %v2755_v4 = vadd.f32 %v2720_v22, %v2648_v12  ;;  %v2781_v6 = vadd.f32 %v5329_v30, %v2689_v46 }
 0x6e8   :  { %v2650_v29 = vpop.f32.mrf.mxu0  ;;  %v3963_v49 = vpop.f32.mrf.mxu1 }
 0x6e9   :  { %4366 = vpow2.f32 %v3555_v25  ;;  %v2728_v50 = vadd.f32 %v2722_v9, %v2650_v29  ;;  %v3559_v59 = vmul.f32 -1.442695, %v2755_v4  ;;  %v2784_v34 = vadd.f32 %v5329_v30, %v3963_v49 }
 0x6ea   :  { %v2652_v38 = vpop.f32.mrf.mxu0  ;;  %4368 = vpow2.f32 %v3557_v13  ;;  %v2692_v39 = vpop.f32.mrf.mxu1 }
 0x6eb   :  { %v3556_v42 = vmul.f32 -1.442695, %v2728_v50  ;;  %v2756_v16 = vadd.f32 %v2723_v35, %v2652_v38  ;;  %v2782_v43 = vadd.f32 %v5329_v30, %v2692_v39  ;;  %v3599_v39 = vld [vmem:[%s5394_s0 + $0x174] sm:$0xff] }
 0x6ed   :  { %4370 = vpow2.f32 %v3556_v42  ;;  %v3560_v20 = vmul.f32 -1.442695, %v2756_v16 }
 0x6ee   :  { %v4363_v8 = vpop.eup %4362  ;;  %4372 = vpow2.f32 %v3558_v3 }
 0x6ef   :  { %v2741_v21 = vadd.f32 1.0, %v4363_v8 }
 0x6f1   :  { %4374 = vrcp.f32 %v2741_v21 }
 0x6f2   :  { %v4365_v60 = vpop.eup %4364  ;;  %4376 = vpow2.f32 %v3559_v59 }
 0x6f3   :  { %v2742_v27 = vadd.f32 1.0, %v4365_v60 }
 0x6f5   :  { %4378 = vrcp.f32 %v2742_v27 }
 0x6f6   :  { %v4367_v45 = vpop.eup %4366  ;;  %4380 = vpow2.f32 %v3560_v20 }
 0x6f7   :  { %v2743_v47 = vadd.f32 1.0, %v4367_v45  ;;  %v4369_v41 = vpop.eup %4368 }
 0x6f8   :  { %v2769_v17 = vadd.f32 1.0, %v4369_v41 }
 0x6f9   :  { %4382 = vrcp.f32 %v2743_v47 }
 0x6fa   :  { %v4371_v48 = vpop.eup %4370 }
 0x6fb   :  { %v4373_v32 = vpop.eup %4372  ;;  %v2744_v52 = vadd.f32 1.0, %v4371_v48 }
 0x6fc   :  { %v2770_v51 = vadd.f32 1.0, %v4373_v32  ;;  %v3597_v32 = vld [vmem:[%s5394_s0 + $0x168] sm:$0xff] }
 0x6fd   :  { %4384 = vrcp.f32 %v2744_v52 }
 0x6fe   :  { %v4375_v28 = vpop.eup %4374  ;;  %4386 = vrcp.f32 %v2769_v17 }
 0x6ff   :  { %v2785_v10 = vmul.f32 %v4375_v28, %v2781_v6  ;;  %v4377_v36 = vpop.eup %4376  ;;  %4388 = vrcp.f32 %v2770_v51  ;;  %v3121_v28 = vunpack.c.l.bf16 %v3597_v32 }
 0x700   :  { %v2771_v55 = vadd.f32 1.0, %v4377_v36 }
 0x701   :  { %v2789_v37 = vadd.f32 %v2785_v10, %v2715_v26 }
 0x702   :  { %v4379_v5 = vpop.eup %4378 }
 0x703   :  { %v4381_v7 = vpop.eup %4380  ;;  %4390 = vtanh.f32 %v2789_v37  ;;  %v2786_v11 = vmul.f32 %v4379_v5, %v2782_v43  ;;  %v3124_v43 = vunpack.c.l.bf16 %v3599_v39 }
 0x704   :  { %v2772_v57 = vadd.f32 1.0, %v4381_v7 }
 0x705   :  { %v2790_v19 = vadd.f32 %v2786_v11, %v2718_v40 }
 0x706   :  { %v4383_v56 = vpop.eup %4382 }
 0x707   :  { %v2787_v58 = vmul.f32 %v4383_v56, %v2783_v18  ;;  %4392 = vtanh.f32 %v2790_v19  ;;  %v3122_v18 = vunpack.c.h.bf16 %v3597_v32 }
 0x708   :  { %4394 = vrcp.f32 %v2771_v55 }
 0x709   :  { %v2791_v61 = vadd.f32 %v2787_v58, %v2721_v14  ;;  %4396 = vrcp.f32 %v2772_v57  ;;  %v3125_v57 = vunpack.c.h.bf16 %v3599_v39 }
 0x70a   :  { %v4385_v62 = vpop.eup %4384 }
 0x70b   :  { %4398 = vtanh.f32 %v2791_v61  ;;  %v2788_v0 = vmul.f32 %v4385_v62, %v2784_v34  ;;  %v4387_v9 = vpop.eup %4386 }
 0x70c   :  { %v4389_v24 = vpop.eup %4388  ;;  %v2797_v25 = vsub.f32 1.0, %v4387_v9  ;;  %v2805_v3 = vmul.f32 %v4387_v9, %v5250_v23 }
 0x70d   :  { %v2792_v2 = vadd.f32 %v2788_v0, %v2724_v33  ;;  %v2798_v13 = vsub.f32 1.0, %v4389_v24  ;;  %v2806_v35 = vmul.f32 %v4389_v24, %v5252_v44 }
 0x70f   :  { %4400 = vtanh.f32 %v2792_v2 }
 0x710   :  { %v4391_v12 = vpop.eup %4390 }
 0x711   :  { %v2801_v22 = vmul.f32 %v4391_v12, %v2797_v25 }
 0x713   :  { %v5340_v4 = vadd.f32 %v2805_v3, %v2801_v22 }
 0x714   :  { %v4393_v29 = vpop.eup %4392 }
 0x715   :  { %v2802_v50 = vmul.f32 %v4393_v29, %v2798_v13  ;;  %v4395_v42 = vpop.eup %4394 }
 0x716   :  { %v4397_v38 = vpop.eup %4396  ;;  %v2799_v59 = vsub.f32 1.0, %v4395_v42  ;;  %v2807_v20 = vmul.f32 %v4395_v42, %v5264_v53 }
 0x717   :  { %v5342_v8 = vadd.f32 %v2806_v35, %v2802_v50  ;;  %v2800_v23 = vsub.f32 1.0, %v4397_v38  ;;  %v2808_v27 = vmul.f32 %v4397_v38, %v5266_v54  ;;  %v3595_v54 = vld [vmem:[%s5394_s0 + $0x15c] sm:$0xff]  ;;  %v3598_v35 = vld [vmem:[%s5394_s0 + $0x158] ss:$24 sps:$4 sm:$0xff]  }
 0x718   :  { %v4399_v16 = vpop.eup %4398  ;;  %v3118_v63 = vunpack.c.l.bf16 %v3595_v54  ;;  %v3119_v31 = vunpack.c.h.bf16 %v3595_v54 }
 0x719   :  { %v3712_v21 = vpack.c.bf16 %v5342_v8, %v5340_v4  ;;  %v2803_v60 = vmul.f32 %v4399_v16, %v2799_v59  ;;  %v3117_v59 = vunpack.c.l.bf16 %v3598_v35 }
 0x71b   :  { %3740 = vst [vmem:[%s5396_s3 + $0x60] sm:$0xff] %v3712_v21   ;;  %3037 = vmatmul.mubr.bf16.vlgmr.msra.gmra.mxu0 %v3712_v21  ;;  %3980 = vmatprep.mubr.bf16.mxu1 %v3712_v21  ;;  %v5352_v45 = vadd.f32 %v2807_v20, %v2803_v60 }
 0x71c   :  { %v4401_v44 = vpop.eup %4400  ;;  %3046 = vmatprep.mubr.bf16.mxu0 %v4444_v1  ;;  %v3593_v1 = vld [vmem:[%s5394_s0 + $0x150] sm:$0xff] }
 0x71d   :  { %v2804_v15 = vmul.f32 %v4401_v44, %v2800_v23  ;;  %v3115_v53 = vunpack.c.l.bf16 %v3593_v1  ;;  %v3116_v17 = vunpack.c.h.bf16 %v3593_v1 }
 0x71f   :  { %v5354_v46 = vadd.f32 %v2808_v27, %v2804_v15  ;;  %v3600_v15 = vld [vmem:[%s5394_s0 + $0x164] ss:$24 sps:$4 sm:$0xff]  }
 0x721   :  { %v3717_v47 = vpack.c.bf16 %v5354_v46, %v5352_v45 }
 0x723   :  { %3741 = vst [vmem:[%s5396_s3 + $0x68] sm:$0xff] %v3717_v47   ;;  %3047 = vmatmul.mubr.bf16.gmra.mxu0 %v3717_v47  ;;  %3981 = vmatmul.mubr.bf16.vlgmr.msra.gmra.mxu1 %v3717_v47 }
 0x7db   :  { %v3038_v41 = vpop.f32.mrf.mxu0 }
 0x7dc   :  { %v3127_v48 = vadd.f32 %v3115_v53, %v3038_v41  ;;  %v3120_v53 = vunpack.c.l.bf16 %v3600_v15 }
 0x7dd   :  { %v3040_v49 = vpop.f32.mrf.mxu0 }
 0x7de   :  { %v3601_v52 = vmul.f32 -1.442695, %v3127_v48  ;;  %v3155_v36 = vadd.f32 %v3116_v17, %v3040_v49  ;;  %v3123_v49 = vunpack.c.h.bf16 %v3598_v35 }
 0x7df   :  { %v3042_v26 = vpop.f32.mrf.mxu0 }
 0x7e0   :  { %4402 = vpow2.f32 %v3601_v52  ;;  %v3128_v6 = vadd.f32 %v3118_v63, %v3042_v26  ;;  %v3605_v14 = vmul.f32 -1.442695, %v3155_v36 }
 0x7e1   :  { %v3044_v51 = vpop.f32.mrf.mxu0 }
 0x7e2   :  { %v3602_v10 = vmul.f32 -1.442695, %v3128_v6  ;;  %v3156_v5 = vadd.f32 %v3119_v31, %v3044_v51  ;;  %v3126_v31 = vunpack.c.h.bf16 %v3600_v15 }
 0x7e3   :  { %v3048_v37 = vpop.f32.mrf.mxu0  ;;  %v3982_v24 = vpop.f32.mrf.mxu1 }
 0x7e4   :  { %4404 = vpow2.f32 %v3602_v10  ;;  %v3129_v40 = vadd.f32 %v3121_v28, %v3048_v37  ;;  %v3606_v56 = vmul.f32 -1.442695, %v3156_v5  ;;  %v3185_v32 = vadd.f32 %v5329_v30, %v3982_v24 }
 0x7e5   :  { %v3050_v7 = vpop.f32.mrf.mxu0  ;;  %v3091_v22 = vpop.f32.mrf.mxu1 }
 0x7e6   :  { %v3603_v11 = vmul.f32 -1.442695, %v3129_v40  ;;  %v3157_v33 = vadd.f32 %v3122_v18, %v3050_v7  ;;  %v3183_v23 = vadd.f32 %v5329_v30, %v3091_v22 }
 0x7e7   :  { %v3052_v55 = vpop.f32.mrf.mxu0  ;;  %v3983_v42 = vpop.f32.mrf.mxu1 }
 0x7e8   :  { %4406 = vpow2.f32 %v3603_v11  ;;  %v3130_v19 = vadd.f32 %v3124_v43, %v3052_v55  ;;  %v3607_v2 = vmul.f32 -1.442695, %v3157_v33  ;;  %v3186_v39 = vadd.f32 %v5329_v30, %v3983_v42 }
 0x7e9   :  { %v3054_v61 = vpop.f32.mrf.mxu0  ;;  %4408 = vpow2.f32 %v3605_v14  ;;  %v3094_v20 = vpop.f32.mrf.mxu1 }
 0x7ea   :  { %v3604_v58 = vmul.f32 -1.442695, %v3130_v19  ;;  %v3158_v62 = vadd.f32 %v3125_v57, %v3054_v61  ;;  %v3184_v54 = vadd.f32 %v5329_v30, %v3094_v20 }
 0x7ec   :  { %4410 = vpow2.f32 %v3604_v58  ;;  %v3608_v12 = vmul.f32 -1.442695, %v3158_v62 }
 0x7ed   :  { %v4403_v34 = vpop.eup %4402  ;;  %4412 = vpow2.f32 %v3606_v56 }
 0x7ee   :  { %v3143_v0 = vadd.f32 1.0, %v4403_v34 }
 0x7f0   :  { %4414 = vrcp.f32 %v3143_v0 }
 0x7f1   :  { %v4405_v9 = vpop.eup %4404  ;;  %4416 = vpow2.f32 %v3607_v2 }
 0x7f2   :  { %v3144_v25 = vadd.f32 1.0, %v4405_v9 }
 0x7f4   :  { %4418 = vrcp.f32 %v3144_v25 }
 0x7f5   :  { %v4407_v13 = vpop.eup %4406  ;;  %4420 = vpow2.f32 %v3608_v12 }
 0x7f6   :  { %v3145_v29 = vadd.f32 1.0, %v4407_v13  ;;  %v4409_v50 = vpop.eup %4408 }
 0x7f7   :  { %v3171_v21 = vadd.f32 1.0, %v4409_v50 }
 0x7f8   :  { %4422 = vrcp.f32 %v3145_v29 }
 0x7f9   :  { %v4411_v3 = vpop.eup %4410 }
 0x7fa   :  { %v4413_v38 = vpop.eup %4412  ;;  %v3146_v16 = vadd.f32 1.0, %v4411_v3 }
 0x7fb   :  { %v3172_v44 = vadd.f32 1.0, %v4413_v38 }
 0x7fc   :  { %4424 = vrcp.f32 %v3146_v16 }
 0x7fd   :  { %v4415_v60 = vpop.eup %4414  ;;  %4426 = vrcp.f32 %v3171_v21 }
 0x7fe   :  { %v3187_v27 = vmul.f32 %v4415_v60, %v3183_v23  ;;  %v4417_v47 = vpop.eup %4416  ;;  %4428 = vrcp.f32 %v3172_v44 }
 0x7ff   :  { %v3173_v52 = vadd.f32 1.0, %v4417_v47 }
 0x800   :  { %v3191_v1 = vadd.f32 %v3187_v27, %v3117_v59 }
 0x801   :  { %v4419_v41 = vpop.eup %4418 }
 0x802   :  { %v4421_v48 = vpop.eup %4420  ;;  %4430 = vtanh.f32 %v3191_v1  ;;  %v3188_v63 = vmul.f32 %v4419_v41, %v3184_v54 }
 0x803   :  { %v3174_v6 = vadd.f32 1.0, %v4421_v48 }
 0x804   :  { %v3192_v17 = vadd.f32 %v3188_v63, %v3120_v53 }
 0x805   :  { %v4423_v26 = vpop.eup %4422 }
 0x806   :  { %v3189_v28 = vmul.f32 %v4423_v26, %v3185_v32  ;;  %4432 = vtanh.f32 %v3192_v17 }
 0x807   :  { %4434 = vrcp.f32 %v3173_v52 }
 0x808   :  { %v3193_v51 = vadd.f32 %v3189_v28, %v3123_v49  ;;  %4436 = vrcp.f32 %v3174_v6 }
 0x809   :  { %v4425_v10 = vpop.eup %4424 }
 0x80a   :  { %4438 = vtanh.f32 %v3193_v51  ;;  %v3190_v36 = vmul.f32 %v4425_v10, %v3186_v39  ;;  %v4427_v40 = vpop.eup %4426 }
 0x80b   :  { %v4429_v43 = vpop.eup %4428  ;;  %v3199_v7 = vsub.f32 1.0, %v4427_v40  ;;  %v3207_v55 = vmul.f32 %v4427_v40, %v5340_v4 }
 0x80c   :  { %v3194_v37 = vadd.f32 %v3190_v36, %v3126_v31  ;;  %v3200_v11 = vsub.f32 1.0, %v4429_v43  ;;  %v3208_v19 = vmul.f32 %v4429_v43, %v5342_v8 }
 0x80e   :  { %4440 = vtanh.f32 %v3194_v37 }
 0x80f   :  { %v4431_v5 = vpop.eup %4430 }
 0x810   :  { %v3203_v14 = vmul.f32 %v4431_v5, %v3199_v7 }
 0x812   :  { %v3211_v58 = vadd.f32 %v3207_v55, %v3203_v14 }
 0x813   :  { %v4433_v18 = vpop.eup %4432 }
 0x814   :  { %v3204_v56 = vmul.f32 %v4433_v18, %v3200_v11  ;;  %v4435_v57 = vpop.eup %4434 }
 0x815   :  { %v4437_v30 = vpop.eup %4436  ;;  %v3201_v34 = vsub.f32 1.0, %v4435_v57  ;;  %v3209_v24 = vmul.f32 %v4435_v57, %v5352_v45 }
 0x816   :  { %v3212_v61 = vadd.f32 %v3208_v19, %v3204_v56  ;;  %v3202_v2 = vsub.f32 1.0, %v4437_v30  ;;  %v3210_v8 = vmul.f32 %v4437_v30, %v5354_v46 }
 0x817   :  { %v4439_v33 = vpop.eup %4438 }
 0x818   :  { %v3722_v62 = vpack.c.bf16 %v3212_v61, %v3211_v58  ;;  %v3205_v0 = vmul.f32 %v4439_v33, %v3201_v34 }
 0x81a   :  { %3742 = vst [vmem:[%s5396_s3 + $0x70] sm:$0xff] %v3722_v62   ;;  %v3213_v12 = vadd.f32 %v3209_v24, %v3205_v0 }
 0x81b   :  { %v4441_v9 = vpop.eup %4440 }
 0x81c   :  { %v3206_v4 = vmul.f32 %v4441_v9, %v3202_v2 }
 0x81e   :  { %v3214_v25 = vadd.f32 %v3210_v8, %v3206_v4 }
 0x820   :  { %v3727_v13 = vpack.c.bf16 %v3214_v25, %v3213_v12 }
 0x822   :  { %3743 = vst [vmem:[%s5396_s3 + $0x78] sm:$0xff] %v3727_v13  }

</bundles_post_ra>
